<compile_context>
chip_gen: v6e
topology: v6e:2x2x1
jax: 0.10.0
libtpu: 0.0.40
codegen_flags: <defaults>
</compile_context>

<pallas_src>
import jax
import jax.numpy as jnp
import numpy as np
from jax.experimental import pallas as pl
from jax.experimental.pallas import tpu as pltpu

B, CIN, H, W = 2, 4, 16, 16
COUT = 8
RED = 2                       # channel-attention reduction ratio
HW = H * W
BHW = B * HW
NCOLS = max(CIN, COUT // RED, 1)

LAYER_ORDER = ('conv1', 'relu', 'ca', 'sa', 'avgpool', 'fc')

# 3x3 tap offsets / lane-roll shifts, tap index t = ky*3 + kx (shared by conv1 and sa).
OFFSETS = tuple((ky - 1) * W + (kx - 1) for ky in range(3) for kx in range(3))
SHIFTS = tuple((-o) % BHW for o in OFFSETS)

VMEM_SPEC = pl.BlockSpec(memory_space=pltpu.MemorySpace.VMEM)
SMEM_SPEC = pl.BlockSpec(memory_space=pltpu.MemorySpace.SMEM)


def _tree_sum(terms):
    """Balanced pairwise reduction (cuts a 9-deep dependent add chain to depth 4)."""
    terms = list(terms)
    while len(terms) > 1:
        nxt = [terms[i] + terms[i + 1] for i in range(0, len(terms) - 1, 2)]
        if len(terms) % 2:
            nxt.append(terms[-1])
        terms = nxt
    return terms[0]


# ------------------------------ specialized fused kernel ------------------------------
def _make_kernel(out_layer):
    stage = LAYER_ORDER.index(out_layer)
    need_relu = stage >= 1
    need_ca = stage >= 2
    need_sa = stage >= 3
    need_pool = stage >= 4

    def kernel(x_ref, wpack_ref, mask_ref, sapack_ref, o_ref):
        # Fold batch into the lane axis (128-aligned lane concat, no host transpose needed).
        xb = jnp.concatenate([x_ref[b] for b in range(B)], axis=1)        # (CIN, B*HW)

        # ---- conv1 (3x3, pad 1) + bias: masked INPUT-side rolls, per-tap MXU contraction,
        #      balanced-tree accumulation.  Center tap needs neither roll nor mask. ----
        terms = []
        for t in range(9):
            if OFFSETS[t] == 0:
                tap = xb
            else:
                tap = mask_ref[t:t + 1, :] * pltpu.roll(xb, shift=SHIFTS[t], axis=1)
            w_t = wpack_ref[t * COUT:(t + 1) * COUT, 0:CIN]               # 8-row aligned load
            terms.append(jnp.dot(w_t, tap, preferred_element_type=jnp.float32))
        conv = _tree_sum(terms) + wpack_ref[9 * COUT:10 * COUT, 0:1]      # (COUT, B*HW)
        feat = conv

        if need_relu:
            r = jnp.maximum(conv, 0.0)                                    # fused ReLU epilogue
            feat = r

        if need_ca:
            # ---- channel attention: module(r) * r ; per-batch stats via 128-aligned lane slices
            w1 = wpack_ref[10 * COUT:11 * COUT, 0:COUT // RED]            # (COUT, COUT//RED)
            w2t = wpack_ref[11 * COUT:12 * COUT, 0:COUT // RED]           # ca_w2.T

            def ca_mlp(v):                 # (COUT,1) -> (COUT,1); pure VPU/XLU, MXU stays free
                hmid = jnp.maximum(jnp.sum(w1 * v, axis=0, keepdims=True), 0.0)
                return jnp.sum(w2t * hmid, axis=1, keepdims=True)

            scales = []
            for b in range(B):
                rb = r[:, b * HW:(b + 1) * HW]
                s = jax.nn.sigmoid(ca_mlp(jnp.mean(rb, axis=1, keepdims=True))
                                   + ca_mlp(jnp.max(rb, axis=1, keepdims=True)))   # (COUT,1)
                scales.append(jnp.broadcast_to(s, (COUT, HW)))
            ca = r * jnp.concatenate(scales, axis=1)                      # (COUT, B*HW)
            feat = ca

        if need_sa:
            # ---- spatial attention: 3x3 conv over [mean, max] channel maps.  Scalar weights are
            #      applied BEFORE the roll so each tap needs one roll instead of two. ----
            amap = jnp.mean(ca, axis=0, keepdims=True)                    # (1, B*HW)
            mmap = jnp.max(ca, axis=0, keepdims=True)                     # (1, B*HW)
            sterms = []
            for t in range(9):
                z = sapack_ref[2 * t] * amap + sapack_ref[2 * t + 1] * mmap
                if OFFSETS[t] == 0:
                    sterms.append(z)
                else:
                    sterms.append(mask_ref[t:t + 1, :] * pltpu.roll(z, shift=SHIFTS[t], axis=1))
            sa = ca * jax.nn.sigmoid(_tree_sum(sterms) + sapack_ref[18])
            feat = sa

        # ---- single requested output (lane-dense 256-wide stores, no host transpose) ----
        if need_pool:
            for b in range(B):
                o_ref[b] = jnp.mean(sa[:, b * HW:(b + 1) * HW], axis=1, keepdims=True)  # (COUT,1)
        else:
            for b in range(B):
                o_ref[b] = feat[:, b * HW:(b + 1) * HW]                                 # (COUT,HW)

    return kernel


# ------------------------- one-time host-side weight / mask prep -------------------------
def prepare_params(params):
    """Hoisted out of the jitted path: packs all small operands into 3 device arrays."""
    wpack = np.zeros((12 * COUT, NCOLS), np.float32)
    w = np.asarray(params['conv1_w'], np.float32)                  # (COUT, CIN, 3, 3)
    for ky in range(3):
        for kx in range(3):
            t = ky * 3 + kx
            wpack[t * COUT:(t + 1) * COUT, :CIN] = w[:, :, ky, kx]
    wpack[9 * COUT:10 * COUT, 0] = np.asarray(params['conv1_b'], np.float32)
    wpack[10 * COUT:11 * COUT, :COUT // RED] = np.asarray(params['ca_w1'], np.float32)
    wpack[11 * COUT:12 * COUT, :COUT // RED] = np.asarray(params['ca_w2'], np.float32).T

    saw = np.asarray(params['sa_w'], np.float32).reshape(2, 9)     # rows: [mean-map, max-map]
    sapack = np.zeros((19,), np.float32)
    sapack[0:18:2] = saw[0]
    sapack[1:18:2] = saw[1]
    sapack[18] = float(np.asarray(params['sa_b'], np.float32).reshape(-1)[0])

    m = np.arange(HW)
    hh, ww = m // W, m % W
    mask = np.zeros((9, HW), np.float32)
    for ky in range(3):
        for kx in range(3):
            dy, dx = ky - 1, kx - 1
            valid = (hh + dy >= 0) & (hh + dy < H) & (ww + dx >= 0) & (ww + dx < W)
            mask[ky * 3 + kx] = valid.astype(np.float32)
    maskp = np.tile(mask, (1, B))                                  # (9, B*HW)

    return {'wpack': jnp.asarray(wpack), 'maskp': jnp.asarray(maskp),
            'sapack': jnp.asarray(sapack)}


# ------------------------------ cached specialized callables ------------------------------
_FUSED_CACHE = {}


def _get_fused(out_layer):
    if out_layer in _FUSED_CACHE:
        return _FUSED_CACHE[out_layer]
    if out_layer in ('avgpool', 'fc'):
        out_shape = jax.ShapeDtypeStruct((B, COUT, 1), jnp.float32)
    else:
        out_shape = jax.ShapeDtypeStruct((B, COUT, HW), jnp.float32)

    bytes_accessed = 4 * (B * CIN * HW + 12 * COUT * NCOLS + 9 * BHW + 19
                          + int(np.prod(out_shape.shape)))
    cost = pl.CostEstimate(flops=2 * 9 * CIN * COUT * BHW + 4 * COUT * BHW,
                           transcendentals=B * (COUT + HW),
                           bytes_accessed=bytes_accessed)

    call = pl.pallas_call(
        _make_kernel(out_layer),
        out_shape=out_shape,
        in_specs=[VMEM_SPEC, VMEM_SPEC, VMEM_SPEC, SMEM_SPEC],
        out_specs=VMEM_SPEC,
        cost_estimate=cost,
        # Deliberately no grid / no core_map: at this footprint (<1 MiB) the kernel is
        # launch-latency bound on v5e/v6e/v7x alike; retile only if the model is scaled up.
    )

    @jax.jit
    def run(x, wpack, maskp, sapack):
        return call(x.reshape(B, CIN, HW), wpack, maskp, sapack)   # pure reshape, no transpose

    _FUSED_CACHE[out_layer] = run
    return run


# -------------------- FeatureExtractor_model.forward replica ----------------------
def feature_extractor_forward(x, prepped, extracted_layers):
    """In the reference forward, `flag` never flips and the torch.cat result is discarded, so
    each extraction overwrites `outputs`; the forward returns the LAST extracted layer (in
    module order).  The kernel is therefore specialized to emit exactly that one layer."""
    last = None
    for name in LAYER_ORDER:
        if name in extracted_layers:
            last = name
    if last is None:
        return None
    y = _get_fused(last)(x, prepped['wpack'], prepped['maskp'], prepped['sapack'])
    if last == 'avgpool':
        return y.reshape(B, COUT, 1, 1)
    if last == 'fc':
        return y.reshape(B, COUT)         # 'fc' only flattens in the reference forward
    return y.reshape(B, COUT, H, W)


# ------------------------------- pure-JAX reference -------------------------------
def reference_forward(x, params, extracted_layers):
    y = jax.lax.conv_general_dilated(
        x, params['conv1_w'], (1, 1), ((1, 1), (1, 1)),
        dimension_numbers=('NCHW', 'OIHW', 'NCHW')) + params['conv1_b'].reshape(1, -1, 1, 1)
    r = jnp.maximum(y, 0.0)
    avg = r.mean(axis=(2, 3)); mx = r.max(axis=(2, 3))

    def mlp(v):
        return jnp.maximum(v @ params['ca_w1'], 0.0) @ params['ca_w2']

    ca = r * jax.nn.sigmoid(mlp(avg) + mlp(mx))[:, :, None, None]
    smap = jnp.concatenate([ca.mean(axis=1, keepdims=True),
                            ca.max(axis=1, keepdims=True)], axis=1)
    sa_logits = jax.lax.conv_general_dilated(
        smap, params['sa_w'], (1, 1), ((1, 1), (1, 1)),
        dimension_numbers=('NCHW', 'OIHW', 'NCHW')) + params['sa_b'].reshape(1, 1, 1, 1)
    sa = ca * jax.nn.sigmoid(sa_logits)
    gap = sa.mean(axis=(2, 3)).reshape(B, COUT, 1, 1)
    fc = gap.reshape(B, -1)
    named = {'conv1': y, 'relu': r, 'ca': ca, 'sa': sa, 'avgpool': gap, 'fc': fc}
    outputs = None
    for name in LAYER_ORDER:
        if name in extracted_layers:
            outputs = named[name]                      # flag never flips -> last wins
    return outputs


if __name__ == "__main__":
    key = jax.random.PRNGKey(0)
    keys = jax.random.split(key, 7)
    params = {
        'conv1_w': 0.1 * jax.random.normal(keys[0], (COUT, CIN, 3, 3), jnp.float32),
        'conv1_b': 0.1 * jax.random.normal(keys[1], (COUT,), jnp.float32),
        'ca_w1':   0.3 * jax.random.normal(keys[2], (COUT, COUT // RED), jnp.float32),
        'ca_w2':   0.3 * jax.random.normal(keys[3], (COUT // RED, COUT), jnp.float32),
        'sa_w':    0.3 * jax.random.normal(keys[4], (1, 2, 3, 3), jnp.float32),
        'sa_b':    0.1 * jax.random.normal(keys[5], (1,), jnp.float32),
    }
    x = jax.random.normal(keys[6], (B, CIN, H, W), jnp.float32)

    prepped = prepare_params(params)                  # one-time weight/mask glue (cached)

    # Same configuration as the original harness: ['sa', 'fc'] -> forward returns the fc view.
    extracted_layers = ['sa', 'fc']
    out = feature_extractor_forward(x, prepped, extracted_layers)
    out = jax.block_until_ready(out)
    ref = reference_forward(x, params, extracted_layers)
    np.testing.assert_allclose(np.asarray(out), np.asarray(ref), rtol=2e-2, atol=2e-2)

    # Stricter per-position check through the conv/ca/sa path (also guards the batch-fold
    # invariant that cross-batch roll wrap is always masked).
    out_sa = jax.block_until_ready(feature_extractor_forward(x, prepped, ['sa']))
    ref_sa = reference_forward(x, params, ['sa'])
    np.testing.assert_allclose(np.asarray(out_sa), np.asarray(ref_sa), rtol=2e-2, atol=2e-2)

    print("KERNEL_OK")
</pallas_src>

<mosaic_0001>
module attributes {stable_mosaic.version = 11 : i64} {
  func.func @kernel(%arg0: memref<2x4x256xf32, #tpu.memory_space<vmem>>, %arg1: memref<96x4xf32, #tpu.memory_space<vmem>>, %arg2: memref<9x512xf32, #tpu.memory_space<vmem>>, %arg3: memref<19xf32, #tpu.memory_space<smem>>, %arg4: memref<2x8x1xf32, #tpu.memory_space<vmem>>) attributes {dimension_semantics = [], scalar_prefetch = 0 : i64, scratch_operands = 0 : i64, tpu.core_type = #tpu.core_type<tc>} {
    %c0 = arith.constant 0 : index
    %c0_0 = arith.constant 0 : index
    %c0_1 = arith.constant 0 : index
    %0 = vector.load %arg0[%c0, %c0_0, %c0_1] : memref<2x4x256xf32, #tpu.memory_space<vmem>>, vector<1x4x256xf32>
    %1 = vector.shape_cast %0 : vector<1x4x256xf32> to vector<4x256xf32>
    %c1 = arith.constant 1 : index
    %c0_2 = arith.constant 0 : index
    %c0_3 = arith.constant 0 : index
    %2 = vector.load %arg0[%c1, %c0_2, %c0_3] : memref<2x4x256xf32, #tpu.memory_space<vmem>>, vector<1x4x256xf32>
    %3 = vector.shape_cast %2 : vector<1x4x256xf32> to vector<4x256xf32>
    %4 = tpu.concatenate %1, %3 in 1 : vector<4x256xf32>, vector<4x256xf32> -> vector<4x512xf32>
    %c0_4 = arith.constant 0 : index
    %c0_5 = arith.constant 0 : index
    %5 = vector.load %arg2[%c0_4, %c0_5] : memref<9x512xf32, #tpu.memory_space<vmem>>, vector<1x512xf32>
    %c17_i32 = arith.constant 17 : i32
    %6 = tpu.dynamic_rotate %4 by %c17_i32 dim 1 : vector<4x512xf32>, i32 -> vector<4x512xf32>
    %7 = vector.broadcast %5 : vector<1x512xf32> to vector<4x512xf32>
    %8 = arith.mulf %7, %6 : vector<4x512xf32>
    %c0_6 = arith.constant 0 : index
    %c0_7 = arith.constant 0 : index
    %9 = vector.load %arg1[%c0_6, %c0_7] : memref<96x4xf32, #tpu.memory_space<vmem>>, vector<8x4xf32>
    %cst = arith.constant dense<0.000000e+00> : vector<8x512xf32>
    %10 = tpu.matmul %9, %8, %cst {dimension_numbers = #tpu.dot_dimension_numbers<[1], [0], [0], [1], [0, 0, 1, 1], [], []>} : vector<8x4xf32>, vector<4x512xf32>, vector<8x512xf32> -> vector<8x512xf32>
    %c1_8 = arith.constant 1 : index
    %c0_9 = arith.constant 0 : index
    %11 = vector.load %arg2[%c1_8, %c0_9] : memref<9x512xf32, #tpu.memory_space<vmem>>, vector<1x512xf32>
    %c16_i32 = arith.constant 16 : i32
    %12 = tpu.dynamic_rotate %4 by %c16_i32 dim 1 : vector<4x512xf32>, i32 -> vector<4x512xf32>
    %13 = vector.broadcast %11 : vector<1x512xf32> to vector<4x512xf32>
    %14 = arith.mulf %13, %12 : vector<4x512xf32>
    %c8 = arith.constant 8 : index
    %c0_10 = arith.constant 0 : index
    %15 = vector.load %arg1[%c8, %c0_10] : memref<96x4xf32, #tpu.memory_space<vmem>>, vector<8x4xf32>
    %cst_11 = arith.constant dense<0.000000e+00> : vector<8x512xf32>
    %16 = tpu.matmul %15, %14, %cst_11 {dimension_numbers = #tpu.dot_dimension_numbers<[1], [0], [0], [1], [0, 0, 1, 1], [], []>} : vector<8x4xf32>, vector<4x512xf32>, vector<8x512xf32> -> vector<8x512xf32>
    %c2 = arith.constant 2 : index
    %c0_12 = arith.constant 0 : index
    %17 = vector.load %arg2[%c2, %c0_12] : memref<9x512xf32, #tpu.memory_space<vmem>>, vector<1x512xf32>
    %c15_i32 = arith.constant 15 : i32
    %18 = tpu.dynamic_rotate %4 by %c15_i32 dim 1 : vector<4x512xf32>, i32 -> vector<4x512xf32>
    %19 = vector.broadcast %17 : vector<1x512xf32> to vector<4x512xf32>
    %20 = arith.mulf %19, %18 : vector<4x512xf32>
    %c16 = arith.constant 16 : index
    %c0_13 = arith.constant 0 : index
    %21 = vector.load %arg1[%c16, %c0_13] : memref<96x4xf32, #tpu.memory_space<vmem>>, vector<8x4xf32>
    %cst_14 = arith.constant dense<0.000000e+00> : vector<8x512xf32>
    %22 = tpu.matmul %21, %20, %cst_14 {dimension_numbers = #tpu.dot_dimension_numbers<[1], [0], [0], [1], [0, 0, 1, 1], [], []>} : vector<8x4xf32>, vector<4x512xf32>, vector<8x512xf32> -> vector<8x512xf32>
    %c3 = arith.constant 3 : index
    %c0_15 = arith.constant 0 : index
    %23 = vector.load %arg2[%c3, %c0_15] : memref<9x512xf32, #tpu.memory_space<vmem>>, vector<1x512xf32>
    %c1_i32 = arith.constant 1 : i32
    %24 = tpu.dynamic_rotate %4 by %c1_i32 dim 1 : vector<4x512xf32>, i32 -> vector<4x512xf32>
    %25 = vector.broadcast %23 : vector<1x512xf32> to vector<4x512xf32>
    %26 = arith.mulf %25, %24 : vector<4x512xf32>
    %c24 = arith.constant 24 : index
    %c0_16 = arith.constant 0 : index
    %27 = vector.load %arg1[%c24, %c0_16] : memref<96x4xf32, #tpu.memory_space<vmem>>, vector<8x4xf32>
    %cst_17 = arith.constant dense<0.000000e+00> : vector<8x512xf32>
    %28 = tpu.matmul %27, %26, %cst_17 {dimension_numbers = #tpu.dot_dimension_numbers<[1], [0], [0], [1], [0, 0, 1, 1], [], []>} : vector<8x4xf32>, vector<4x512xf32>, vector<8x512xf32> -> vector<8x512xf32>
    %c32 = arith.constant 32 : index
    %c0_18 = arith.constant 0 : index
    %29 = vector.load %arg1[%c32, %c0_18] : memref<96x4xf32, #tpu.memory_space<vmem>>, vector<8x4xf32>
    %cst_19 = arith.constant dense<0.000000e+00> : vector<8x512xf32>
    %30 = tpu.matmul %29, %4, %cst_19 {dimension_numbers = #tpu.dot_dimension_numbers<[1], [0], [0], [1], [0, 0, 1, 1], [], []>} : vector<8x4xf32>, vector<4x512xf32>, vector<8x512xf32> -> vector<8x512xf32>
    %c5 = arith.constant 5 : index
    %c0_20 = arith.constant 0 : index
    %31 = vector.load %arg2[%c5, %c0_20] : memref<9x512xf32, #tpu.memory_space<vmem>>, vector<1x512xf32>
    %c511_i32 = arith.constant 511 : i32
    %32 = tpu.dynamic_rotate %4 by %c511_i32 dim 1 : vector<4x512xf32>, i32 -> vector<4x512xf32>
    %33 = vector.broadcast %31 : vector<1x512xf32> to vector<4x512xf32>
    %34 = arith.mulf %33, %32 : vector<4x512xf32>
    %c40 = arith.constant 40 : index
    %c0_21 = arith.constant 0 : index
    %35 = vector.load %arg1[%c40, %c0_21] : memref<96x4xf32, #tpu.memory_space<vmem>>, vector<8x4xf32>
    %cst_22 = arith.constant dense<0.000000e+00> : vector<8x512xf32>
    %36 = tpu.matmul %35, %34, %cst_22 {dimension_numbers = #tpu.dot_dimension_numbers<[1], [0], [0], [1], [0, 0, 1, 1], [], []>} : vector<8x4xf32>, vector<4x512xf32>, vector<8x512xf32> -> vector<8x512xf32>
    %c6 = arith.constant 6 : index
    %c0_23 = arith.constant 0 : index
    %37 = vector.load %arg2[%c6, %c0_23] : memref<9x512xf32, #tpu.memory_space<vmem>>, vector<1x512xf32>
    %c497_i32 = arith.constant 497 : i32
    %38 = tpu.dynamic_rotate %4 by %c497_i32 dim 1 : vector<4x512xf32>, i32 -> vector<4x512xf32>
    %39 = vector.broadcast %37 : vector<1x512xf32> to vector<4x512xf32>
    %40 = arith.mulf %39, %38 : vector<4x512xf32>
    %c48 = arith.constant 48 : index
    %c0_24 = arith.constant 0 : index
    %41 = vector.load %arg1[%c48, %c0_24] : memref<96x4xf32, #tpu.memory_space<vmem>>, vector<8x4xf32>
    %cst_25 = arith.constant dense<0.000000e+00> : vector<8x512xf32>
    %42 = tpu.matmul %41, %40, %cst_25 {dimension_numbers = #tpu.dot_dimension_numbers<[1], [0], [0], [1], [0, 0, 1, 1], [], []>} : vector<8x4xf32>, vector<4x512xf32>, vector<8x512xf32> -> vector<8x512xf32>
    %c7 = arith.constant 7 : index
    %c0_26 = arith.constant 0 : index
    %43 = vector.load %arg2[%c7, %c0_26] : memref<9x512xf32, #tpu.memory_space<vmem>>, vector<1x512xf32>
    %c496_i32 = arith.constant 496 : i32
    %44 = tpu.dynamic_rotate %4 by %c496_i32 dim 1 : vector<4x512xf32>, i32 -> vector<4x512xf32>
    %45 = vector.broadcast %43 : vector<1x512xf32> to vector<4x512xf32>
    %46 = arith.mulf %45, %44 : vector<4x512xf32>
    %c56 = arith.constant 56 : index
    %c0_27 = arith.constant 0 : index
    %47 = vector.load %arg1[%c56, %c0_27] : memref<96x4xf32, #tpu.memory_space<vmem>>, vector<8x4xf32>
    %cst_28 = arith.constant dense<0.000000e+00> : vector<8x512xf32>
    %48 = tpu.matmul %47, %46, %cst_28 {dimension_numbers = #tpu.dot_dimension_numbers<[1], [0], [0], [1], [0, 0, 1, 1], [], []>} : vector<8x4xf32>, vector<4x512xf32>, vector<8x512xf32> -> vector<8x512xf32>
    %c8_29 = arith.constant 8 : index
    %c0_30 = arith.constant 0 : index
    %49 = vector.load %arg2[%c8_29, %c0_30] : memref<9x512xf32, #tpu.memory_space<vmem>>, vector<1x512xf32>
    %c495_i32 = arith.constant 495 : i32
    %50 = tpu.dynamic_rotate %4 by %c495_i32 dim 1 : vector<4x512xf32>, i32 -> vector<4x512xf32>
    %51 = vector.broadcast %49 : vector<1x512xf32> to vector<4x512xf32>
    %52 = arith.mulf %51, %50 : vector<4x512xf32>
    %c64 = arith.constant 64 : index
    %c0_31 = arith.constant 0 : index
    %53 = vector.load %arg1[%c64, %c0_31] : memref<96x4xf32, #tpu.memory_space<vmem>>, vector<8x4xf32>
    %cst_32 = arith.constant dense<0.000000e+00> : vector<8x512xf32>
    %54 = tpu.matmul %53, %52, %cst_32 {dimension_numbers = #tpu.dot_dimension_numbers<[1], [0], [0], [1], [0, 0, 1, 1], [], []>} : vector<8x4xf32>, vector<4x512xf32>, vector<8x512xf32> -> vector<8x512xf32>
    %55 = arith.addf %10, %16 : vector<8x512xf32>
    %56 = arith.addf %22, %28 : vector<8x512xf32>
    %57 = arith.addf %30, %36 : vector<8x512xf32>
    %58 = arith.addf %42, %48 : vector<8x512xf32>
    %59 = arith.addf %55, %56 : vector<8x512xf32>
    %60 = arith.addf %57, %58 : vector<8x512xf32>
    %61 = arith.addf %59, %60 : vector<8x512xf32>
    %62 = arith.addf %61, %54 : vector<8x512xf32>
    %c72 = arith.constant 72 : index
    %c0_33 = arith.constant 0 : index
    %63 = vector.load %arg1[%c72, %c0_33] : memref<96x4xf32, #tpu.memory_space<vmem>>, vector<8x1xf32>
    %64 = vector.broadcast %63 : vector<8x1xf32> to vector<8x512xf32>
    %65 = arith.addf %62, %64 : vector<8x512xf32>
    %cst_34 = arith.constant 0.000000e+00 : f32
    %66 = vector.broadcast %cst_34 : f32 to vector<8x512xf32>
    %67 = arith.maximumf %65, %66 : vector<8x512xf32>
    %c80 = arith.constant 80 : index
    %c0_35 = arith.constant 0 : index
    %68 = vector.load %arg1[%c80, %c0_35] : memref<96x4xf32, #tpu.memory_space<vmem>>, vector<8x4xf32>
    %c88 = arith.constant 88 : index
    %c0_36 = arith.constant 0 : index
    %69 = vector.load %arg1[%c88, %c0_36] : memref<96x4xf32, #tpu.memory_space<vmem>>, vector<8x4xf32>
    %70 = vector.extract_strided_slice %67 {offsets = [0, 0], sizes = [8, 256], strides = [1, 1]} : vector<8x512xf32> to vector<8x256xf32>
    %cst_37 = arith.constant dense<0.000000e+00> : vector<8xf32>
    %71 = vector.multi_reduction <add>, %70, %cst_37 [1] : vector<8x256xf32> to vector<8xf32>
    %72 = vector.shape_cast %71 : vector<8xf32> to vector<8x1xf32>
    %cst_38 = arith.constant 2.560000e+02 : f32
    %73 = vector.broadcast %cst_38 : f32 to vector<8x1xf32>
    %74 = arith.divf %72, %73 : vector<8x1xf32>
    %75 = vector.broadcast %74 : vector<8x1xf32> to vector<8x4xf32>
    %76 = arith.mulf %68, %75 : vector<8x4xf32>
    %cst_39 = arith.constant dense<0.000000e+00> : vector<4xf32>
    %77 = vector.multi_reduction <add>, %76, %cst_39 [0] : vector<8x4xf32> to vector<4xf32>
    %78 = vector.shape_cast %77 : vector<4xf32> to vector<1x4xf32>
    %cst_40 = arith.constant 0.000000e+00 : f32
    %79 = vector.broadcast %cst_40 : f32 to vector<1x4xf32>
    %80 = arith.maximumf %78, %79 : vector<1x4xf32>
    %81 = vector.broadcast %80 : vector<1x4xf32> to vector<8x4xf32>
    %82 = arith.mulf %69, %81 : vector<8x4xf32>
    %cst_41 = arith.constant dense<0.000000e+00> : vector<8xf32>
    %83 = vector.multi_reduction <add>, %82, %cst_41 [1] : vector<8x4xf32> to vector<8xf32>
    %84 = vector.shape_cast %83 : vector<8xf32> to vector<8x1xf32>
    %cst_42 = arith.constant dense<0xFF800000> : vector<8xf32>
    %85 = vector.multi_reduction <maximumf>, %70, %cst_42 [1] : vector<8x256xf32> to vector<8xf32>
    %86 = vector.shape_cast %85 : vector<8xf32> to vector<8x1xf32>
    %87 = vector.broadcast %86 : vector<8x1xf32> to vector<8x4xf32>
    %88 = arith.mulf %68, %87 : vector<8x4xf32>
    %cst_43 = arith.constant dense<0.000000e+00> : vector<4xf32>
    %89 = vector.multi_reduction <add>, %88, %cst_43 [0] : vector<8x4xf32> to vector<4xf32>
    %90 = vector.shape_cast %89 : vector<4xf32> to vector<1x4xf32>
    %cst_44 = arith.constant 0.000000e+00 : f32
    %91 = vector.broadcast %cst_44 : f32 to vector<1x4xf32>
    %92 = arith.maximumf %90, %91 : vector<1x4xf32>
    %93 = vector.broadcast %92 : vector<1x4xf32> to vector<8x4xf32>
    %94 = arith.mulf %69, %93 : vector<8x4xf32>
    %cst_45 = arith.constant dense<0.000000e+00> : vector<8xf32>
    %95 = vector.multi_reduction <add>, %94, %cst_45 [1] : vector<8x4xf32> to vector<8xf32>
    %96 = vector.shape_cast %95 : vector<8xf32> to vector<8x1xf32>
    %97 = arith.addf %84, %96 : vector<8x1xf32>
    %98 = arith.negf %97 : vector<8x1xf32>
    %99 = math.exp %98 : vector<8x1xf32>
    %cst_46 = arith.constant 1.000000e+00 : f32
    %100 = vector.broadcast %cst_46 : f32 to vector<8x1xf32>
    %101 = arith.addf %100, %99 : vector<8x1xf32>
    %102 = arith.divf %100, %101 : vector<8x1xf32>
    %103 = vector.shape_cast %102 : vector<8x1xf32> to vector<8x1xf32>
    %104 = vector.broadcast %103 : vector<8x1xf32> to vector<8x256xf32>
    %105 = vector.extract_strided_slice %67 {offsets = [0, 256], sizes = [8, 256], strides = [1, 1]} : vector<8x512xf32> to vector<8x256xf32>
    %cst_47 = arith.constant dense<0.000000e+00> : vector<8xf32>
    %106 = vector.multi_reduction <add>, %105, %cst_47 [1] : vector<8x256xf32> to vector<8xf32>
    %107 = vector.shape_cast %106 : vector<8xf32> to vector<8x1xf32>
    %cst_48 = arith.constant 2.560000e+02 : f32
    %108 = vector.broadcast %cst_48 : f32 to vector<8x1xf32>
    %109 = arith.divf %107, %108 : vector<8x1xf32>
    %110 = vector.broadcast %109 : vector<8x1xf32> to vector<8x4xf32>
    %111 = arith.mulf %68, %110 : vector<8x4xf32>
    %cst_49 = arith.constant dense<0.000000e+00> : vector<4xf32>
    %112 = vector.multi_reduction <add>, %111, %cst_49 [0] : vector<8x4xf32> to vector<4xf32>
    %113 = vector.shape_cast %112 : vector<4xf32> to vector<1x4xf32>
    %cst_50 = arith.constant 0.000000e+00 : f32
    %114 = vector.broadcast %cst_50 : f32 to vector<1x4xf32>
    %115 = arith.maximumf %113, %114 : vector<1x4xf32>
    %116 = vector.broadcast %115 : vector<1x4xf32> to vector<8x4xf32>
    %117 = arith.mulf %69, %116 : vector<8x4xf32>
    %cst_51 = arith.constant dense<0.000000e+00> : vector<8xf32>
    %118 = vector.multi_reduction <add>, %117, %cst_51 [1] : vector<8x4xf32> to vector<8xf32>
    %119 = vector.shape_cast %118 : vector<8xf32> to vector<8x1xf32>
    %cst_52 = arith.constant dense<0xFF800000> : vector<8xf32>
    %120 = vector.multi_reduction <maximumf>, %105, %cst_52 [1] : vector<8x256xf32> to vector<8xf32>
    %121 = vector.shape_cast %120 : vector<8xf32> to vector<8x1xf32>
    %122 = vector.broadcast %121 : vector<8x1xf32> to vector<8x4xf32>
    %123 = arith.mulf %68, %122 : vector<8x4xf32>
    %cst_53 = arith.constant dense<0.000000e+00> : vector<4xf32>
    %124 = vector.multi_reduction <add>, %123, %cst_53 [0] : vector<8x4xf32> to vector<4xf32>
    %125 = vector.shape_cast %124 : vector<4xf32> to vector<1x4xf32>
    %cst_54 = arith.constant 0.000000e+00 : f32
    %126 = vector.broadcast %cst_54 : f32 to vector<1x4xf32>
    %127 = arith.maximumf %125, %126 : vector<1x4xf32>
    %128 = vector.broadcast %127 : vector<1x4xf32> to vector<8x4xf32>
    %129 = arith.mulf %69, %128 : vector<8x4xf32>
    %cst_55 = arith.constant dense<0.000000e+00> : vector<8xf32>
    %130 = vector.multi_reduction <add>, %129, %cst_55 [1] : vector<8x4xf32> to vector<8xf32>
    %131 = vector.shape_cast %130 : vector<8xf32> to vector<8x1xf32>
    %132 = arith.addf %119, %131 : vector<8x1xf32>
    %133 = arith.negf %132 : vector<8x1xf32>
    %134 = math.exp %133 : vector<8x1xf32>
    %cst_56 = arith.constant 1.000000e+00 : f32
    %135 = vector.broadcast %cst_56 : f32 to vector<8x1xf32>
    %136 = arith.addf %135, %134 : vector<8x1xf32>
    %137 = arith.divf %135, %136 : vector<8x1xf32>
    %138 = vector.shape_cast %137 : vector<8x1xf32> to vector<8x1xf32>
    %139 = vector.broadcast %138 : vector<8x1xf32> to vector<8x256xf32>
    %140 = tpu.concatenate %104, %139 in 1 : vector<8x256xf32>, vector<8x256xf32> -> vector<8x512xf32>
    %141 = arith.mulf %67, %140 : vector<8x512xf32>
    %cst_57 = arith.constant dense<0.000000e+00> : vector<512xf32>
    %142 = vector.multi_reduction <add>, %141, %cst_57 [0] : vector<8x512xf32> to vector<512xf32>
    %143 = vector.shape_cast %142 : vector<512xf32> to vector<1x512xf32>
    %cst_58 = arith.constant 8.000000e+00 : f32
    %144 = vector.broadcast %cst_58 : f32 to vector<1x512xf32>
    %145 = arith.divf %143, %144 : vector<1x512xf32>
    %cst_59 = arith.constant dense<0xFF800000> : vector<512xf32>
    %146 = vector.multi_reduction <maximumf>, %141, %cst_59 [0] : vector<8x512xf32> to vector<512xf32>
    %147 = vector.shape_cast %146 : vector<512xf32> to vector<1x512xf32>
    %c0_60 = arith.constant 0 : index
    %148 = memref.load %arg3[%c0_60] : memref<19xf32, #tpu.memory_space<smem>>
    %149 = vector.broadcast %148 : f32 to vector<1x512xf32>
    %150 = arith.mulf %149, %145 : vector<1x512xf32>
    %c1_61 = arith.constant 1 : index
    %151 = memref.load %arg3[%c1_61] : memref<19xf32, #tpu.memory_space<smem>>
    %152 = vector.broadcast %151 : f32 to vector<1x512xf32>
    %153 = arith.mulf %152, %147 : vector<1x512xf32>
    %154 = arith.addf %150, %153 : vector<1x512xf32>
    %c0_62 = arith.constant 0 : index
    %c0_63 = arith.constant 0 : index
    %155 = vector.load %arg2[%c0_62, %c0_63] : memref<9x512xf32, #tpu.memory_space<vmem>>, vector<1x512xf32>
    %c17_i32_64 = arith.constant 17 : i32
    %156 = tpu.dynamic_rotate %154 by %c17_i32_64 dim 1 : vector<1x512xf32>, i32 -> vector<1x512xf32>
    %157 = arith.mulf %155, %156 : vector<1x512xf32>
    %c2_65 = arith.constant 2 : index
    %158 = memref.load %arg3[%c2_65] : memref<19xf32, #tpu.memory_space<smem>>
    %159 = vector.broadcast %158 : f32 to vector<1x512xf32>
    %160 = arith.mulf %159, %145 : vector<1x512xf32>
    %c3_66 = arith.constant 3 : index
    %161 = memref.load %arg3[%c3_66] : memref<19xf32, #tpu.memory_space<smem>>
    %162 = vector.broadcast %161 : f32 to vector<1x512xf32>
    %163 = arith.mulf %162, %147 : vector<1x512xf32>
    %164 = arith.addf %160, %163 : vector<1x512xf32>
    %c1_67 = arith.constant 1 : index
    %c0_68 = arith.constant 0 : index
    %165 = vector.load %arg2[%c1_67, %c0_68] : memref<9x512xf32, #tpu.memory_space<vmem>>, vector<1x512xf32>
    %c16_i32_69 = arith.constant 16 : i32
    %166 = tpu.dynamic_rotate %164 by %c16_i32_69 dim 1 : vector<1x512xf32>, i32 -> vector<1x512xf32>
    %167 = arith.mulf %165, %166 : vector<1x512xf32>
    %c4 = arith.constant 4 : index
    %168 = memref.load %arg3[%c4] : memref<19xf32, #tpu.memory_space<smem>>
    %169 = vector.broadcast %168 : f32 to vector<1x512xf32>
    %170 = arith.mulf %169, %145 : vector<1x512xf32>
    %c5_70 = arith.constant 5 : index
    %171 = memref.load %arg3[%c5_70] : memref<19xf32, #tpu.memory_space<smem>>
    %172 = vector.broadcast %171 : f32 to vector<1x512xf32>
    %173 = arith.mulf %172, %147 : vector<1x512xf32>
    %174 = arith.addf %170, %173 : vector<1x512xf32>
    %c2_71 = arith.constant 2 : index
    %c0_72 = arith.constant 0 : index
    %175 = vector.load %arg2[%c2_71, %c0_72] : memref<9x512xf32, #tpu.memory_space<vmem>>, vector<1x512xf32>
    %c15_i32_73 = arith.constant 15 : i32
    %176 = tpu.dynamic_rotate %174 by %c15_i32_73 dim 1 : vector<1x512xf32>, i32 -> vector<1x512xf32>
    %177 = arith.mulf %175, %176 : vector<1x512xf32>
    %c6_74 = arith.constant 6 : index
    %178 = memref.load %arg3[%c6_74] : memref<19xf32, #tpu.memory_space<smem>>
    %179 = vector.broadcast %178 : f32 to vector<1x512xf32>
    %180 = arith.mulf %179, %145 : vector<1x512xf32>
    %c7_75 = arith.constant 7 : index
    %181 = memref.load %arg3[%c7_75] : memref<19xf32, #tpu.memory_space<smem>>
    %182 = vector.broadcast %181 : f32 to vector<1x512xf32>
    %183 = arith.mulf %182, %147 : vector<1x512xf32>
    %184 = arith.addf %180, %183 : vector<1x512xf32>
    %c3_76 = arith.constant 3 : index
    %c0_77 = arith.constant 0 : index
    %185 = vector.load %arg2[%c3_76, %c0_77] : memref<9x512xf32, #tpu.memory_space<vmem>>, vector<1x512xf32>
    %c1_i32_78 = arith.constant 1 : i32
    %186 = tpu.dynamic_rotate %184 by %c1_i32_78 dim 1 : vector<1x512xf32>, i32 -> vector<1x512xf32>
    %187 = arith.mulf %185, %186 : vector<1x512xf32>
    %c8_79 = arith.constant 8 : index
    %188 = memref.load %arg3[%c8_79] : memref<19xf32, #tpu.memory_space<smem>>
    %189 = vector.broadcast %188 : f32 to vector<1x512xf32>
    %190 = arith.mulf %189, %145 : vector<1x512xf32>
    %c9 = arith.constant 9 : index
    %191 = memref.load %arg3[%c9] : memref<19xf32, #tpu.memory_space<smem>>
    %192 = vector.broadcast %191 : f32 to vector<1x512xf32>
    %193 = arith.mulf %192, %147 : vector<1x512xf32>
    %194 = arith.addf %190, %193 : vector<1x512xf32>
    %c10 = arith.constant 10 : index
    %195 = memref.load %arg3[%c10] : memref<19xf32, #tpu.memory_space<smem>>
    %196 = vector.broadcast %195 : f32 to vector<1x512xf32>
    %197 = arith.mulf %196, %145 : vector<1x512xf32>
    %c11 = arith.constant 11 : index
    %198 = memref.load %arg3[%c11] : memref<19xf32, #tpu.memory_space<smem>>
    %199 = vector.broadcast %198 : f32 to vector<1x512xf32>
    %200 = arith.mulf %199, %147 : vector<1x512xf32>
    %201 = arith.addf %197, %200 : vector<1x512xf32>
    %c5_80 = arith.constant 5 : index
    %c0_81 = arith.constant 0 : index
    %202 = vector.load %arg2[%c5_80, %c0_81] : memref<9x512xf32, #tpu.memory_space<vmem>>, vector<1x512xf32>
    %c511_i32_82 = arith.constant 511 : i32
    %203 = tpu.dynamic_rotate %201 by %c511_i32_82 dim 1 : vector<1x512xf32>, i32 -> vector<1x512xf32>
    %204 = arith.mulf %202, %203 : vector<1x512xf32>
    %c12 = arith.constant 12 : index
    %205 = memref.load %arg3[%c12] : memref<19xf32, #tpu.memory_space<smem>>
    %206 = vector.broadcast %205 : f32 to vector<1x512xf32>
    %207 = arith.mulf %206, %145 : vector<1x512xf32>
    %c13 = arith.constant 13 : index
    %208 = memref.load %arg3[%c13] : memref<19xf32, #tpu.memory_space<smem>>
    %209 = vector.broadcast %208 : f32 to vector<1x512xf32>
    %210 = arith.mulf %209, %147 : vector<1x512xf32>
    %211 = arith.addf %207, %210 : vector<1x512xf32>
    %c6_83 = arith.constant 6 : index
    %c0_84 = arith.constant 0 : index
    %212 = vector.load %arg2[%c6_83, %c0_84] : memref<9x512xf32, #tpu.memory_space<vmem>>, vector<1x512xf32>
    %c497_i32_85 = arith.constant 497 : i32
    %213 = tpu.dynamic_rotate %211 by %c497_i32_85 dim 1 : vector<1x512xf32>, i32 -> vector<1x512xf32>
    %214 = arith.mulf %212, %213 : vector<1x512xf32>
    %c14 = arith.constant 14 : index
    %215 = memref.load %arg3[%c14] : memref<19xf32, #tpu.memory_space<smem>>
    %216 = vector.broadcast %215 : f32 to vector<1x512xf32>
    %217 = arith.mulf %216, %145 : vector<1x512xf32>
    %c15 = arith.constant 15 : index
    %218 = memref.load %arg3[%c15] : memref<19xf32, #tpu.memory_space<smem>>
    %219 = vector.broadcast %218 : f32 to vector<1x512xf32>
    %220 = arith.mulf %219, %147 : vector<1x512xf32>
    %221 = arith.addf %217, %220 : vector<1x512xf32>
    %c7_86 = arith.constant 7 : index
    %c0_87 = arith.constant 0 : index
    %222 = vector.load %arg2[%c7_86, %c0_87] : memref<9x512xf32, #tpu.memory_space<vmem>>, vector<1x512xf32>
    %c496_i32_88 = arith.constant 496 : i32
    %223 = tpu.dynamic_rotate %221 by %c496_i32_88 dim 1 : vector<1x512xf32>, i32 -> vector<1x512xf32>
    %224 = arith.mulf %222, %223 : vector<1x512xf32>
    %c16_89 = arith.constant 16 : index
    %225 = memref.load %arg3[%c16_89] : memref<19xf32, #tpu.memory_space<smem>>
    %226 = vector.broadcast %225 : f32 to vector<1x512xf32>
    %227 = arith.mulf %226, %145 : vector<1x512xf32>
    %c17 = arith.constant 17 : index
    %228 = memref.load %arg3[%c17] : memref<19xf32, #tpu.memory_space<smem>>
    %229 = vector.broadcast %228 : f32 to vector<1x512xf32>
    %230 = arith.mulf %229, %147 : vector<1x512xf32>
    %231 = arith.addf %227, %230 : vector<1x512xf32>
    %c8_90 = arith.constant 8 : index
    %c0_91 = arith.constant 0 : index
    %232 = vector.load %arg2[%c8_90, %c0_91] : memref<9x512xf32, #tpu.memory_space<vmem>>, vector<1x512xf32>
    %c495_i32_92 = arith.constant 495 : i32
    %233 = tpu.dynamic_rotate %231 by %c495_i32_92 dim 1 : vector<1x512xf32>, i32 -> vector<1x512xf32>
    %234 = arith.mulf %232, %233 : vector<1x512xf32>
    %235 = arith.addf %157, %167 : vector<1x512xf32>
    %236 = arith.addf %177, %187 : vector<1x512xf32>
    %237 = arith.addf %194, %204 : vector<1x512xf32>
    %238 = arith.addf %214, %224 : vector<1x512xf32>
    %239 = arith.addf %235, %236 : vector<1x512xf32>
    %240 = arith.addf %237, %238 : vector<1x512xf32>
    %241 = arith.addf %239, %240 : vector<1x512xf32>
    %242 = arith.addf %241, %234 : vector<1x512xf32>
    %c18 = arith.constant 18 : index
    %243 = memref.load %arg3[%c18] : memref<19xf32, #tpu.memory_space<smem>>
    %244 = vector.broadcast %243 : f32 to vector<1x512xf32>
    %245 = arith.addf %242, %244 : vector<1x512xf32>
    %246 = arith.negf %245 : vector<1x512xf32>
    %247 = math.exp %246 : vector<1x512xf32>
    %cst_93 = arith.constant 1.000000e+00 : f32
    %248 = vector.broadcast %cst_93 : f32 to vector<1x512xf32>
    %249 = arith.addf %248, %247 : vector<1x512xf32>
    %250 = arith.divf %248, %249 : vector<1x512xf32>
    %251 = vector.broadcast %250 : vector<1x512xf32> to vector<8x512xf32>
    %252 = arith.mulf %141, %251 : vector<8x512xf32>
    %253 = vector.extract_strided_slice %252 {offsets = [0, 0], sizes = [8, 256], strides = [1, 1]} : vector<8x512xf32> to vector<8x256xf32>
    %cst_94 = arith.constant dense<0.000000e+00> : vector<8xf32>
    %254 = vector.multi_reduction <add>, %253, %cst_94 [1] : vector<8x256xf32> to vector<8xf32>
    %255 = vector.shape_cast %254 : vector<8xf32> to vector<8x1xf32>
    %cst_95 = arith.constant 2.560000e+02 : f32
    %256 = vector.broadcast %cst_95 : f32 to vector<8x1xf32>
    %257 = arith.divf %255, %256 : vector<8x1xf32>
    %c0_96 = arith.constant 0 : index
    %c0_97 = arith.constant 0 : index
    %c0_98 = arith.constant 0 : index
    %258 = vector.load %arg4[%c0_96, %c0_97, %c0_98] : memref<2x8x1xf32, #tpu.memory_space<vmem>>, vector<1x8x1xf32>
    %259 = vector.shape_cast %258 : vector<1x8x1xf32> to vector<8x1xf32>
    %260 = vector.shape_cast %257 : vector<8x1xf32> to vector<1x8x1xf32>
    tpu.vector_store %arg4[%c0_96, %c0_97, %c0_98], %260 {strides = array<i32>} : memref<2x8x1xf32, #tpu.memory_space<vmem>>, vector<1x8x1xf32>,
    %261 = vector.extract_strided_slice %252 {offsets = [0, 256], sizes = [8, 256], strides = [1, 1]} : vector<8x512xf32> to vector<8x256xf32>
    %cst_99 = arith.constant dense<0.000000e+00> : vector<8xf32>
    %262 = vector.multi_reduction <add>, %261, %cst_99 [1] : vector<8x256xf32> to vector<8xf32>
    %263 = vector.shape_cast %262 : vector<8xf32> to vector<8x1xf32>
    %cst_100 = arith.constant 2.560000e+02 : f32
    %264 = vector.broadcast %cst_100 : f32 to vector<8x1xf32>
    %265 = arith.divf %263, %264 : vector<8x1xf32>
    %c1_101 = arith.constant 1 : index
    %c0_102 = arith.constant 0 : index
    %c0_103 = arith.constant 0 : index
    %266 = vector.load %arg4[%c1_101, %c0_102, %c0_103] : memref<2x8x1xf32, #tpu.memory_space<vmem>>, vector<1x8x1xf32>
    %267 = vector.shape_cast %266 : vector<1x8x1xf32> to vector<8x1xf32>
    %268 = vector.shape_cast %265 : vector<8x1xf32> to vector<1x8x1xf32>
    tpu.vector_store %arg4[%c1_101, %c0_102, %c0_103], %268 {strides = array<i32>} : memref<2x8x1xf32, #tpu.memory_space<vmem>>, vector<1x8x1xf32>,
    return
  }
}

</mosaic_0001>

<bundles_post_ra>
// kernel: run.1
= control target key start
LH: loop header
LB: loop body
LE: loop exit
PB: predicated region body
PF: predicated region fallthrough
CT: control target
= control target key end

     0   :  { %9 = vsyncpa [#allocation3], 0  ;;  %s3415_s0 = inlined_call_operand.vmem [shape: f32[2,4,256], index: 0, kind: input, shape index: {}]   ;;  %s3416_s1 = inlined_call_operand.vmem [shape: f32[96,4], index: 1, kind: input, shape index: {}]   ;;  %s3417_s2 = inlined_call_operand.vmem [shape: f32[9,512], index: 2, kind: input, shape index: {}]   ;;  %s3418_s3 = inlined_call_operand.vmem [shape: f32[19], index: 3, kind: input, shape index: {}]   ;;  %s3419_s4 = inlined_call_operand.vmem [shape: f32[2,8,1], index: 4, kind: output, shape index: {}]  }
   0x1   :  { %s22_s17 = sshll.u32 %s3418_s3, 4  ;;  %s23_s17 = int_to_ptr.vmem [resolvable:$true] %s22_s17 }
   0x2   :  { %s2684_s18 = scalar_lea.vmem %s23_s17, 16  ;;  %p2689_p1 = scmp.lt.s32.totalorder %s23_s17, %s23_s17 }
   0x3   :  { %p2685_p0 = scmp.ne.s32.totalorder %s23_s17, %s2684_s18  ;;  %p2690_p2 = scmp.lt.s32.totalorder %s2684_s18, %s2684_s18 }
   0x5   :  { %p2691_p3 = por %p2690_p2, %p2689_p1 }
   0x7   :  { %p2692_p4 = pnand %p2691_p3, %p2685_p0 }
   0x9   :  { %2695 = shalt.err (!%p2692_p4)
}
   0xa   :  { %s2698_s19 = smov [#allocation2]  }
   0xb   :  { %25 = dma.vmem_to_smem %s23_s17, 16, %s2698_s19, [#allocation3]  }
   0xc   :  { %2696 = dma.done.wait [#allocation3], 16  }
   0xd   :  { %2697 = vsyncadd [#allocation3], 4294967280 }
   0xe   :  { %29 = sfence }
   0xf   :  { %v2741_v0 = vld [vmem:[%s3415_s0 + $0x8] sm:$0xff]  ;;  %v2746_v1 = vld [vmem:[%s3415_s0] sm:$0xff]  ;;  %s2699_s23 = smov 16   ;;  %v2700_v4 = vmov 0.0   ;;  %s2701_s0 = smov 1   ;;  %v2707_v5 = vmov 0   ;;  %v48_v7 = vlaneseq }
  0x10   :  { %87 = vrot.lane.b32.xlu1 %v2741_v0, %s2699_s23  ;;  %83 = vrot.lane.b32.xlu0 %v2746_v1, %s2699_s23  ;;  %v2754_v2 = vcombine.high %v2741_v0, %v2741_v0  ;;  %v2758_v3 = vcombine.high %v2746_v1, %v2746_v1  ;;  %s2702_s24 = smov 127   ;;  %s2703_s25 = smov 112   ;;  %v1796_v6 = vld [vmem:[%s3416_s1 + $0x48] sm:$0xff]  ;;  %vm126_vm1 = vcmask 1043456   ;;  %vm122_vm3 = vcmask 31744   ;;  %v362_v49 = vld [vmem:[%s3416_s1 + $0x18] sm:$0xff] }
  0x11   :  { %203 = vmatprep.mubr.f32.mxu0 %v2700_v4  ;;  %274 = vmatprep.mubr.f32.mxu1 %v2700_v4  ;;  %s2704_s26 = smov 111   ;;  %s2705_s27 = smov 17   ;;  %v2825_v8 = vshrl.u32 %v48_v7, 7  ;;  %v2827_v9 = vand.u32 127, %v48_v7  ;;  %v121_v33 = vld [vmem:[%s3416_s1 + $0x8] sm:$0xff]  ;;  %vm2553_vm10 = vcmask 7168  }
  0x12   :  { %s2706_s28 = smov 15   ;;  %2662 = vset.pattern.permute.xlu0 %v2707_v5  ;;  %s2708_s29 = smov 113   ;;  %v2567_v14 = vld [vmem:[%s3417_s2 + $0x1] ss:$8 sm:$0xf] }
  0x13   :  { %v2830_v10 = vsub.s32 0, %v2825_v8  ;;  %v2833_v11 = vsub.s32 2, %v2825_v8  ;;  %v2836_v12 = vsub.s32 3, %v2825_v8  ;;  %v2839_v13 = vsub.s32 1, %v2825_v8  ;;  %s2639_s30 = sld [smem:[#allocation2 + $0xa]] }
  0x14   :  { %89 = vrot.lane.b32.xlu1 %v2754_v2, %s2699_s23  ;;  %85 = vrot.lane.b32.xlu0 %v2758_v3, %s2699_s23  ;;  %vm91_vm0 = vcmp.lt.s32.totalorder %v2827_v9, 16  ;;  %v2575_v17 = vld [vmem:[%s3417_s2 + $0x3] ss:$8 sm:$0xf]  ;;  %vm332_vm2 = vcmp.lt.s32.totalorder %v2827_v9, 1  ;;  %vm531_vm4 = vcmp.lt.s32.totalorder %v2827_v9, 127 }
  0x15   :  { %v100_v18 = vrot.slane %v2567_v14, %v2830_v10  ;;  %v108_v19 = vrot.slane %v2567_v14, %v2833_v11  ;;  %v112_v20 = vrot.slane %v2567_v14, %v2836_v12  ;;  %v104_v21 = vrot.slane %v2567_v14, %v2839_v13  ;;  %v2582_v51 = vld [vmem:[%s3417_s2 + $0x5] ss:$8 sm:$0xf]  ;;  %s3124_s5 = sld [smem:[#allocation2 + $0xd]] }
  0x16   :  { %v345_v24 = vrot.slane %v2575_v17, %v2839_v13  ;;  %v341_v37 = vrot.slane %v2575_v17, %v2830_v10  ;;  %v349_v39 = vrot.slane %v2575_v17, %v2833_v11  ;;  %v353_v40 = vrot.slane %v2575_v17, %v2836_v12  ;;  %v561_v14 = vld [vmem:[%s3416_s1 + $0x28] sm:$0xff]  ;;  %s3130_s6 = sld [smem:[#allocation2 + $0xc]] }
  0x17   :  { %v552_v53 = vrot.slane %v2582_v51, %v2836_v12  ;;  %v544_v54 = vrot.slane %v2582_v51, %v2839_v13  ;;  %v548_v55 = vrot.slane %v2582_v51, %v2833_v11  ;;  %v540_v56 = vrot.slane %v2582_v51, %v2830_v10  ;;  %s2643_s7 = sld [smem:[#allocation2 + $0xe]] }
  0x18   :  { %326 = vrot.lane.b32.xlu1 %v2758_v3, %s2701_s0  ;;  %324 = vrot.lane.b32.xlu0 %v2746_v1, %s2701_s0  ;;  %vm770_vm5 = vcmp.lt.s32.totalorder %v2827_v9, 112  ;;  %vm968_vm6 = vcmp.lt.s32.totalorder %v2827_v9, 111  ;;  %vm50_vm7 = vcmp.lt.s32.totalorder %v2827_v9, 17  ;;  %vm291_vm8 = vcmp.lt.s32.totalorder %v2827_v9, 15  ;;  %s2644_s8 = sld [smem:[#allocation2 + $0xf]] }
  0x19   :  { %vm729_vm9 = vcmp.lt.s32.totalorder %v2827_v9, 113  ;;  %s1950_s9 = sld [smem:[#allocation2]] }
  0x1a   :  { %s2630_s10 = sld [smem:[#allocation2 + $0x1]] }
  0x1b   :  { %s2637_s11 = sld [smem:[#allocation2 + $0x8]] }
  0x1c   :  { %330 = vrot.lane.b32.xlu1 %v2754_v2, %s2701_s0  ;;  %328 = vrot.lane.b32.xlu0 %v2741_v0, %s2701_s0  ;;  %s2631_s12 = sld [smem:[#allocation2 + $0x2]] }
  0x1d   :  { %s2638_s13 = sld [smem:[#allocation2 + $0x9]] }
  0x1e   :  { %s2632_s14 = sld [smem:[#allocation2 + $0x3]] }
  0x1f   :  { %s2635_s15 = sld [smem:[#allocation2 + $0x6]] }
  0x20   :  { %525 = vrot.lane.b32.xlu1 %v2758_v3, %s2702_s24  ;;  %523 = vrot.lane.b32.xlu0 %v2746_v1, %s2702_s24  ;;  %s2645_s16 = sld [smem:[#allocation2 + $0x10]] }
  0x24   :  { %529 = vrot.lane.b32.xlu1 %v2754_v2, %s2702_s24  ;;  %527 = vrot.lane.b32.xlu0 %v2741_v0, %s2702_s24 }
  0x28   :  { %764 = vrot.lane.b32.xlu1 %v2758_v3, %s2703_s25  ;;  %762 = vrot.lane.b32.xlu0 %v2746_v1, %s2703_s25 }
  0x2c   :  { %768 = vrot.lane.b32.xlu1 %v2754_v2, %s2703_s25  ;;  %766 = vrot.lane.b32.xlu0 %v2741_v0, %s2703_s25 }
  0x30   :  { %962 = vrot.lane.b32.xlu1 %v2758_v3, %s2704_s26  ;;  %960 = vrot.lane.b32.xlu0 %v2746_v1, %s2704_s26 }
  0x34   :  { %966 = vrot.lane.b32.xlu1 %v2754_v2, %s2704_s26  ;;  %964 = vrot.lane.b32.xlu0 %v2741_v0, %s2704_s26 }
  0x38   :  { %42 = vrot.lane.b32.xlu1 %v2758_v3, %s2705_s27  ;;  %40 = vrot.lane.b32.xlu0 %v2746_v1, %s2705_s27 }
  0x3c   :  { %46 = vrot.lane.b32.xlu1 %v2754_v2, %s2705_s27  ;;  %44 = vrot.lane.b32.xlu0 %v2741_v0, %s2705_s27 }
  0x40   :  { %285 = vrot.lane.b32.xlu1 %v2758_v3, %s2706_s28  ;;  %283 = vrot.lane.b32.xlu0 %v2746_v1, %s2706_s28 }
  0x44   :  { %289 = vrot.lane.b32.xlu1 %v2754_v2, %s2706_s28  ;;  %287 = vrot.lane.b32.xlu0 %v2741_v0, %s2706_s28 }
  0x48   :  { %723 = vrot.lane.b32.xlu1 %v2758_v3, %s2708_s29  ;;  %721 = vrot.lane.b32.xlu0 %v2746_v1, %s2708_s29 }
  0x4c   :  { %727 = vrot.lane.b32.xlu1 %v2754_v2, %s2708_s29  ;;  %725 = vrot.lane.b32.xlu0 %v2741_v0, %s2708_s29 }
  0x50   :  { %1799 = vperm.xlu0 %2662, %v1796_v6  }
  0x82   :  { %v88_v15 = vpop.permute.xlu1 %87  ;;  %v84_v16 = vpop.permute.xlu0 %83 }
  0x86   :  { %v90_v22 = vpop.permute.xlu1 %89  ;;  %v86_v23 = vpop.permute.xlu0 %85 }
  0x87   :  { %v92_v25 = vsel %vm91_vm0, %v88_v15, %v90_v22  ;;  %v95_v26 = vsel %vm91_vm0, %v90_v22, %v84_v16  ;;  %v93_v27 = vsel %vm91_vm0, %v86_v23, %v88_v15  ;;  %v94_v28 = vsel %vm91_vm0, %v84_v16, %v86_v23  ;;  %v2590_v16 = vld [vmem:[%s3417_s2 + $0x7] ss:$8 sm:$0xf] }
  0x88   :  { %v117_v29 = vmul.f32 %v100_v18, %v95_v26  ;;  %v119_v30 = vmul.f32 %v108_v19, %v93_v27  ;;  %v120_v31 = vmul.f32 %v112_v20, %v92_v25  ;;  %v118_v32 = vmul.f32 %v104_v21, %v94_v28 }
  0x89   :  { %v791_v18 = vrot.slane %v2590_v16, %v2836_v12  ;;  %v783_v19 = vrot.slane %v2590_v16, %v2839_v13  ;;  %v787_v20 = vrot.slane %v2590_v16, %v2833_v11  ;;  %v779_v21 = vrot.slane %v2590_v16, %v2830_v10 }
  0x8a   :  { %2571 = vmatprep.subr.msk.mxu1 %vm126_vm1, %v120_v31  ;;  %v327_v34 = vpop.permute.xlu1 %326  ;;  %2568 = vmatprep.subr.msk.mxu0 %vm126_vm1, %v118_v32  ;;  %v325_v35 = vpop.permute.xlu0 %324  ;;  %v800_v32 = vld [vmem:[%s3416_s1 + $0x38] sm:$0xff] }
  0x8b   :  { %v335_v36 = vsel %vm332_vm2, %v325_v35, %v327_v34  ;;  %2569 = vmatpush1.msk.msra.mxu0 %vm126_vm1, %v117_v29  ;;  %2572 = vmatpush1.msk.msra.mxu1 %vm126_vm1, %v119_v30 }
  0x8c   :  { %v359_v38 = vmul.f32 %v345_v24, %v335_v36  ;;  %2570 = vmatmul.mubr.msk.f32.vlgmr.msra.gmra.mxu0 %vm122_vm3, %v121_v33  ;;  %2573 = vmatmul.mubr.msk.f32.vlgmr.msra.gmra.mxu1 %vm122_vm3, %v121_v33 }
  0x8d   :  { %442 = vmatprep.mubr.f32.mxu0 %v2700_v4  ;;  %513 = vmatprep.mubr.f32.mxu1 %v2700_v4 }
  0x8e   :  { %v331_v41 = vpop.permute.xlu1 %330  ;;  %2576 = vmatprep.subr.msk.mxu0 %vm126_vm1, %v359_v38  ;;  %v329_v42 = vpop.permute.xlu0 %328 }
  0x8f   :  { %v336_v43 = vsel %vm332_vm2, %v331_v41, %v325_v35  ;;  %v333_v44 = vsel %vm332_vm2, %v329_v42, %v331_v41  ;;  %v334_v45 = vsel %vm332_vm2, %v327_v34, %v329_v42  ;;  %v2597_v34 = vld [vmem:[%s3417_s2 + $0x20] ss:$8 sm:$0xf] }
  0x90   :  { %v358_v46 = vmul.f32 %v341_v37, %v336_v43  ;;  %v360_v47 = vmul.f32 %v349_v39, %v334_v45  ;;  %v361_v48 = vmul.f32 %v353_v40, %v333_v44  ;;  %v989_v36 = vrot.slane %v2597_v34, %v2836_v12  ;;  %v39_v40 = vld [vmem:[%s3417_s2] ss:$8 sm:$0xf] }
  0x91   :  { %v981_v37 = vrot.slane %v2597_v34, %v2839_v13  ;;  %v985_v38 = vrot.slane %v2597_v34, %v2833_v11  ;;  %v977_v39 = vrot.slane %v2597_v34, %v2830_v10 }
  0x92   :  { %v526_v50 = vpop.permute.xlu1 %525  ;;  %2577 = vmatpush1.msk.msra.mxu0 %vm126_vm1, %v358_v46  ;;  %2579 = vmatprep.subr.msk.mxu1 %vm126_vm1, %v361_v48  ;;  %v524_v52 = vpop.permute.xlu0 %523 }
  0x93   :  { %2580 = vmatpush1.msk.msra.mxu1 %vm126_vm1, %v360_v47  ;;  %2578 = vmatmul.mubr.msk.f32.vlgmr.msra.gmra.mxu0 %vm122_vm3, %v362_v49  ;;  %v534_v57 = vsel %vm531_vm4, %v524_v52, %v526_v50 }
  0x94   :  { %2581 = vmatmul.mubr.msk.f32.vlgmr.msra.gmra.mxu1 %vm122_vm3, %v362_v49  ;;  %641 = vmatprep.mubr.f32.mxu0 %v2700_v4  ;;  %v557_v7 = vmul.f32 %v540_v56, %v534_v57  ;;  %v59_v56 = vrot.slane %v39_v40, %v2830_v10 }
  0x95   :  { %712 = vmatprep.mubr.f32.mxu1 %v2700_v4 }
  0x96   :  { %v530_v58 = vpop.permute.xlu1 %529  ;;  %v528_v59 = vpop.permute.xlu0 %527 }
  0x97   :  { %v535_v60 = vsel %vm531_vm4, %v530_v58, %v524_v52  ;;  %v532_v61 = vsel %vm531_vm4, %v528_v59, %v530_v58  ;;  %v533_v62 = vsel %vm531_vm4, %v526_v50, %v528_v59  ;;  %v63_v50 = vrot.slane %v39_v40, %v2839_v13  ;;  %v998_v52 = vld [vmem:[%s3416_s1 + $0x40] sm:$0xff] }
  0x98   :  { %v560_v63 = vmul.f32 %v552_v53, %v535_v60  ;;  %v558_v5 = vmul.f32 %v544_v54, %v533_v62  ;;  %v559_v6 = vmul.f32 %v548_v55, %v532_v61  ;;  %v67_v58 = vrot.slane %v39_v40, %v2833_v11  ;;  %v2574_v60 = vld [vmem:[%s3417_s2 + $0x2] ss:$8 sm:$0xf] }
  0x99   :  { %v71_v59 = vrot.slane %v39_v40, %v2836_v12  ;;  %v304_v16 = vrot.slane %v2574_v60, %v2839_v13  ;;  %v520_v40 = vld [vmem:[%s3416_s1 + $0x20] sm:$0xff] }
  0x9a   :  { %v765_v15 = vpop.permute.xlu1 %764  ;;  %2583 = vmatprep.subr.msk.mxu0 %vm126_vm1, %v558_v5  ;;  %2586 = vmatprep.subr.msk.mxu1 %vm126_vm1, %v560_v63  ;;  %v763_v17 = vpop.permute.xlu0 %762 }
  0x9b   :  { %2584 = vmatpush1.msk.msra.mxu0 %vm126_vm1, %v557_v7  ;;  %2587 = vmatpush1.msk.msra.mxu1 %vm126_vm1, %v559_v6  ;;  %v773_v22 = vsel %vm770_vm5, %v763_v17, %v765_v15 }
  0x9c   :  { %2585 = vmatmul.mubr.msk.f32.vlgmr.msra.gmra.mxu0 %vm122_vm3, %v561_v14  ;;  %2588 = vmatmul.mubr.msk.f32.vlgmr.msra.gmra.mxu1 %vm122_vm3, %v561_v14  ;;  %v796_v31 = vmul.f32 %v779_v21, %v773_v22  ;;  %v300_v21 = vrot.slane %v2574_v60, %v2830_v10 }
  0x9d   :  { %880 = vmatprep.mubr.f32.mxu0 %v2700_v4  ;;  %951 = vmatprep.mubr.f32.mxu1 %v2700_v4 }
  0x9e   :  { %v769_v23 = vpop.permute.xlu1 %768  ;;  %v767_v24 = vpop.permute.xlu0 %766 }
  0x9f   :  { %v774_v25 = vsel %vm770_vm5, %v769_v23, %v763_v17  ;;  %v771_v26 = vsel %vm770_vm5, %v767_v24, %v769_v23  ;;  %v772_v27 = vsel %vm770_vm5, %v765_v15, %v767_v24  ;;  %v80_v17 = vld [vmem:[%s3416_s1] sm:$0xff]  ;;  %v308_v23 = vrot.slane %v2574_v60, %v2833_v11 }
  0xa0   :  { %v799_v28 = vmul.f32 %v791_v18, %v774_v25  ;;  %v797_v29 = vmul.f32 %v783_v19, %v772_v27  ;;  %v798_v30 = vmul.f32 %v787_v20, %v771_v26  ;;  %v312_v24 = vrot.slane %v2574_v60, %v2836_v12 }
  0xa2   :  { %v963_v33 = vpop.permute.xlu1 %962  ;;  %2591 = vmatprep.subr.msk.mxu0 %vm126_vm1, %v797_v29  ;;  %2594 = vmatprep.subr.msk.mxu1 %vm126_vm1, %v799_v28  ;;  %v961_v35 = vpop.permute.xlu0 %960 }
  0xa3   :  { %2592 = vmatpush1.msk.msra.mxu0 %vm126_vm1, %v796_v31  ;;  %2595 = vmatpush1.msk.msra.mxu1 %vm126_vm1, %v798_v30  ;;  %v971_v41 = vsel %vm968_vm6, %v961_v35, %v963_v33 }
  0xa4   :  { %2593 = vmatmul.mubr.msk.f32.vlgmr.msra.gmra.mxu0 %vm122_vm3, %v800_v32  ;;  %2596 = vmatmul.mubr.msk.f32.vlgmr.msra.gmra.mxu1 %vm122_vm3, %v800_v32  ;;  %v994_v51 = vmul.f32 %v977_v39, %v971_v41 }
  0xa5   :  { %1078 = vmatprep.mubr.f32.mxu0 %v2700_v4  ;;  %1149 = vmatprep.mubr.f32.mxu1 %v2700_v4 }
  0xa6   :  { %v967_v42 = vpop.permute.xlu1 %966  ;;  %v965_v43 = vpop.permute.xlu0 %964 }
  0xa7   :  { %v972_v44 = vsel %vm968_vm6, %v967_v42, %v961_v35  ;;  %v969_v45 = vsel %vm968_vm6, %v965_v43, %v967_v42  ;;  %v970_v46 = vsel %vm968_vm6, %v963_v33, %v965_v43  ;;  %v321_v33 = vld [vmem:[%s3416_s1 + $0x10] sm:$0xff] }
  0xa8   :  { %v997_v47 = vmul.f32 %v989_v36, %v972_v44  ;;  %v995_v48 = vmul.f32 %v981_v37, %v970_v46  ;;  %v996_v49 = vmul.f32 %v985_v38, %v969_v45  ;;  %v3028_v35 = vld [vmem:[%s3417_s2 + $0x6] ss:$8 sm:$0xf] }
  0xa9   :  { %v750_v37 = vrot.slane %v3028_v35, %v2836_v12  ;;  %v742_v38 = vrot.slane %v3028_v35, %v2839_v13  ;;  %v746_v39 = vrot.slane %v3028_v35, %v2833_v11  ;;  %v738_v41 = vrot.slane %v3028_v35, %v2830_v10 }
  0xaa   :  { %v43_v53 = vpop.permute.xlu1 %42  ;;  %2598 = vmatprep.subr.msk.mxu0 %vm126_vm1, %v995_v48  ;;  %2601 = vmatprep.subr.msk.mxu1 %vm126_vm1, %v997_v47  ;;  %v41_v54 = vpop.permute.xlu0 %40 }
  0xab   :  { %v53_v55 = vsel %vm50_vm7, %v41_v54, %v43_v53  ;;  %2599 = vmatpush1.msk.msra.mxu0 %vm126_vm1, %v994_v51  ;;  %2602 = vmatpush1.msk.msra.mxu1 %vm126_vm1, %v996_v49  ;;  %v759_v49 = vld [vmem:[%s3416_s1 + $0x30] sm:$0xff] }
  0xac   :  { %v77_v57 = vmul.f32 %v63_v50, %v53_v55  ;;  %2600 = vmatmul.mubr.msk.f32.vlgmr.msra.gmra.mxu0 %vm122_vm3, %v998_v52  ;;  %2603 = vmatmul.mubr.msk.f32.vlgmr.msra.gmra.mxu1 %vm122_vm3, %v998_v52 }
  0xad   :  { %1235 = vmatprep.mubr.f32.mxu0 %v2700_v4  ;;  %1306 = vmatprep.mubr.f32.mxu1 %v2700_v4 }
  0xae   :  { %v47_v61 = vpop.permute.xlu1 %46  ;;  %2604 = vmatprep.subr.msk.mxu0 %vm126_vm1, %v77_v57  ;;  %v45_v62 = vpop.permute.xlu0 %44 }
  0xaf   :  { %v54_v63 = vsel %vm50_vm7, %v47_v61, %v41_v54  ;;  %v51_v5 = vsel %vm50_vm7, %v45_v62, %v47_v61  ;;  %v52_v6 = vsel %vm50_vm7, %v43_v53, %v45_v62 }
  0xb0   :  { %v76_v7 = vmul.f32 %v59_v56, %v54_v63  ;;  %v78_v14 = vmul.f32 %v67_v58, %v52_v6  ;;  %v79_v15 = vmul.f32 %v71_v59, %v51_v5 }
  0xb2   :  { %v286_v18 = vpop.permute.xlu1 %285  ;;  %2605 = vmatpush1.msk.msra.mxu0 %vm126_vm1, %v76_v7  ;;  %2607 = vmatprep.subr.msk.mxu1 %vm126_vm1, %v79_v15  ;;  %v284_v19 = vpop.permute.xlu0 %283 }
  0xb3   :  { %v294_v20 = vsel %vm291_vm8, %v284_v19, %v286_v18  ;;  %2606 = vmatmul.mubr.msk.f32.vlgmr.msra.gmra.mxu0 %vm122_vm3, %v80_v17  ;;  %2608 = vmatpush1.msk.msra.mxu1 %vm126_vm1, %v78_v14 }
  0xb4   :  { %v318_v22 = vmul.f32 %v304_v16, %v294_v20  ;;  %2609 = vmatmul.mubr.msk.f32.vlgmr.msra.gmra.mxu1 %vm122_vm3, %v80_v17  ;;  %1392 = vmatprep.mubr.f32.mxu0 %v2700_v4 }
  0xb5   :  { %1463 = vmatprep.mubr.f32.mxu1 %v2700_v4 }
  0xb6   :  { %v290_v25 = vpop.permute.xlu1 %289  ;;  %2610 = vmatprep.subr.msk.mxu0 %vm126_vm1, %v318_v22  ;;  %v288_v26 = vpop.permute.xlu0 %287 }
  0xb7   :  { %v295_v27 = vsel %vm291_vm8, %v290_v25, %v284_v19  ;;  %v292_v28 = vsel %vm291_vm8, %v288_v26, %v290_v25  ;;  %v293_v29 = vsel %vm291_vm8, %v286_v18, %v288_v26 }
  0xb8   :  { %v317_v30 = vmul.f32 %v300_v21, %v295_v27  ;;  %v319_v31 = vmul.f32 %v308_v23, %v293_v29  ;;  %v320_v32 = vmul.f32 %v312_v24, %v292_v28 }
  0xba   :  { %v724_v34 = vpop.permute.xlu1 %723  ;;  %2611 = vmatpush1.msk.msra.mxu0 %vm126_vm1, %v317_v30  ;;  %2613 = vmatprep.subr.msk.mxu1 %vm126_vm1, %v320_v32  ;;  %v722_v36 = vpop.permute.xlu0 %721 }
  0xbb   :  { %2612 = vmatmul.mubr.msk.f32.vlgmr.msra.gmra.mxu0 %vm122_vm3, %v321_v33  ;;  %2614 = vmatpush1.msk.msra.mxu1 %vm126_vm1, %v319_v31 }
  0xbc   :  { %2615 = vmatmul.mubr.msk.f32.vlgmr.msra.gmra.mxu1 %vm122_vm3, %v321_v33  ;;  %2616 = vmatprep.subr.msk.mxu0 %vm126_vm1, %v2758_v3  ;;  %v732_v3 = vsel %vm729_vm9, %v722_v36, %v724_v34 }
  0xbd   :  { %2617 = vmatpush1.msk.msra.mxu0 %vm126_vm1, %v2746_v1  ;;  %1545 = vmatprep.mubr.f32.mxu0 %v2700_v4  ;;  %v755_v48 = vmul.f32 %v738_v41, %v732_v3 }
  0xbe   :  { %v728_v42 = vpop.permute.xlu1 %727  ;;  %2619 = vmatprep.subr.msk.mxu1 %vm126_vm1, %v2754_v2  ;;  %v726_v43 = vpop.permute.xlu0 %725  ;;  %1616 = vmatprep.mubr.f32.mxu1 %v2700_v4 }
  0xbf   :  { %v733_v44 = vsel %vm729_vm9, %v728_v42, %v722_v36  ;;  %v730_v45 = vsel %vm729_vm9, %v726_v43, %v728_v42  ;;  %v731_v1 = vsel %vm729_vm9, %v724_v34, %v726_v43  ;;  %2618 = vmatmul.mubr.msk.f32.vlgmr.msra.gmra.mxu0 %vm122_vm3, %v520_v40  ;;  %2620 = vmatpush1.msk.msra.mxu1 %vm126_vm1, %v2741_v0 }
  0xc0   :  { %v758_v46 = vmul.f32 %v750_v37, %v733_v44  ;;  %v756_v47 = vmul.f32 %v742_v38, %v731_v1  ;;  %v757_v2 = vmul.f32 %v746_v39, %v730_v45  ;;  %2621 = vmatmul.mubr.msk.f32.vlgmr.msra.gmra.mxu1 %vm122_vm3, %v520_v40  ;;  %1702 = vmatprep.mubr.f32.mxu0 %v2700_v4 }
  0xc1   :  { %1773 = vmatprep.mubr.f32.mxu1 %v2700_v4 }
  0xc2   :  { %2622 = vmatprep.subr.msk.mxu0 %vm126_vm1, %v756_v47  ;;  %2625 = vmatprep.subr.msk.mxu1 %vm126_vm1, %v758_v46 }
  0xc3   :  { %2623 = vmatpush1.msk.msra.mxu0 %vm126_vm1, %v755_v48  ;;  %2626 = vmatpush1.msk.msra.mxu1 %vm126_vm1, %v757_v2 }
  0xc4   :  { %2624 = vmatmul.mubr.msk.f32.vlgmr.msra.gmra.mxu0 %vm122_vm3, %v759_v49  ;;  %2627 = vmatmul.mubr.msk.f32.vlgmr.msra.gmra.mxu1 %vm122_vm3, %v759_v49 }
 0x14c   :  { %v205_v0 = vpop.f32.mrf.mxu0  ;;  %v276_v50 = vpop.f32.mrf.mxu1 }
 0x14e   :  { %v207_v51 = vpop.f32.mrf.mxu0  ;;  %v278_v4 = vpop.f32.mrf.mxu1 }
 0x153   :  { %v444_v52 = vpop.f32.mrf.mxu0 }
 0x154   :  { %v515_v53 = vpop.f32.mrf.mxu1 }
 0x155   :  { %v446_v54 = vpop.f32.mrf.mxu0 }
 0x156   :  { %v517_v55 = vpop.f32.mrf.mxu1 }
 0x15c   :  { %v643_v56 = vpop.f32.mrf.mxu0  ;;  %v714_v57 = vpop.f32.mrf.mxu1 }
 0x15e   :  { %v645_v58 = vpop.f32.mrf.mxu0  ;;  %v716_v59 = vpop.f32.mrf.mxu1 }
 0x164   :  { %v882_v60 = vpop.f32.mrf.mxu0  ;;  %v953_v61 = vpop.f32.mrf.mxu1 }
 0x166   :  { %v884_v62 = vpop.f32.mrf.mxu0  ;;  %v955_v63 = vpop.f32.mrf.mxu1 }
 0x16c   :  { %v1080_v5 = vpop.f32.mrf.mxu0  ;;  %v1151_v6 = vpop.f32.mrf.mxu1 }
 0x16e   :  { %v1082_v7 = vpop.f32.mrf.mxu0  ;;  %v1153_v14 = vpop.f32.mrf.mxu1 }
 0x173   :  { %v1237_v15 = vpop.f32.mrf.mxu0 }
 0x174   :  { %v1308_v16 = vpop.f32.mrf.mxu1  ;;  %v1238_v29 = vadd.f32 %v1237_v15, %v205_v0 }
 0x175   :  { %v1239_v17 = vpop.f32.mrf.mxu0  ;;  %v1309_v30 = vadd.f32 %v1308_v16, %v276_v50 }
 0x176   :  { %v1310_v18 = vpop.f32.mrf.mxu1  ;;  %v1240_v31 = vadd.f32 %v1239_v17, %v207_v51 }
 0x177   :  { %v1311_v32 = vadd.f32 %v1310_v18, %v278_v4 }
 0x17b   :  { %v1394_v19 = vpop.f32.mrf.mxu0 }
 0x17c   :  { %v1465_v20 = vpop.f32.mrf.mxu1  ;;  %v1395_v26 = vadd.f32 %v1394_v19, %v444_v52  ;;  %v1810_v19 = vld [vmem:[%s3416_s1 + $0x50] sm:$0xff] }
 0x17d   :  { %v1396_v21 = vpop.f32.mrf.mxu0  ;;  %v1466_v27 = vadd.f32 %v1465_v20, %v515_v53  ;;  %v1800_v53 = vpop.permute.xlu0 %1799 }
 0x17e   :  { %v1467_v22 = vpop.f32.mrf.mxu1  ;;  %v1397_v33 = vadd.f32 %v1396_v21, %v446_v54  ;;  %v1780_v3 = vadd.f32 %v1395_v26, %v1238_v29 }
 0x17f   :  { %v1547_v23 = vpop.f32.mrf.mxu0  ;;  %v1468_v34 = vadd.f32 %v1467_v22, %v517_v55  ;;  %v1782_v42 = vadd.f32 %v1466_v27, %v1309_v30 }
 0x180   :  { %v1618_v24 = vpop.f32.mrf.mxu1  ;;  %v1548_v38 = vadd.f32 %v1547_v23, %v643_v56  ;;  %v1781_v49 = vadd.f32 %v1397_v33, %v1240_v31 }
 0x181   :  { %v1549_v25 = vpop.f32.mrf.mxu0  ;;  %v1619_v39 = vadd.f32 %v1618_v24, %v714_v57  ;;  %v1783_v0 = vadd.f32 %v1468_v34, %v1311_v32 }
 0x182   :  { %v1620_v28 = vpop.f32.mrf.mxu1  ;;  %v1550_v43 = vadd.f32 %v1549_v25, %v645_v58 }
 0x183   :  { %v1621_v44 = vadd.f32 %v1620_v28, %v716_v59 }
 0x184   :  { %v1704_v36 = vpop.f32.mrf.mxu0  ;;  %v1775_v37 = vpop.f32.mrf.mxu1 }
 0x185   :  { %v1705_v40 = vadd.f32 %v1704_v36, %v882_v60  ;;  %v1776_v41 = vadd.f32 %v1775_v37, %v953_v61 }
 0x186   :  { %v1706_v45 = vpop.f32.mrf.mxu0  ;;  %v1777_v1 = vpop.f32.mrf.mxu1 }
 0x187   :  { %v1784_v46 = vadd.f32 %v1705_v40, %v1548_v38  ;;  %v1786_v47 = vadd.f32 %v1776_v41, %v1619_v39  ;;  %v1707_v2 = vadd.f32 %v1706_v45, %v884_v62  ;;  %v1778_v48 = vadd.f32 %v1777_v1, %v955_v63 }
 0x189   :  { %v1788_v50 = vadd.f32 %v1784_v46, %v1780_v3  ;;  %v1790_v51 = vadd.f32 %v1786_v47, %v1782_v42  ;;  %v1785_v4 = vadd.f32 %v1707_v2, %v1550_v43  ;;  %v1787_v52 = vadd.f32 %v1778_v48, %v1621_v44 }
 0x18b   :  { %v1792_v54 = vadd.f32 %v1788_v50, %v1080_v5  ;;  %v1794_v55 = vadd.f32 %v1790_v51, %v1151_v6  ;;  %v1789_v56 = vadd.f32 %v1785_v4, %v1781_v49  ;;  %v1791_v57 = vadd.f32 %v1787_v52, %v1783_v0  ;;  %v1811_v52 = vld [vmem:[%s3416_s1 + $0x58] sm:$0xff]  ;;  %s2640_s1 = sld [smem:[#allocation2 + $0xb]] }
 0x18d   :  { %v1793_v60 = vadd.f32 %v1789_v56, %v1082_v7  ;;  %v1795_v58 = vadd.f32 %v1791_v57, %v1153_v14  ;;  %v1802_v59 = vadd.f32 %v1800_v53, %v1792_v54  ;;  %v1804_v61 = vadd.f32 %v1800_v53, %v1794_v55 }
 0x18f   :  { %v1803_v15 = vadd.f32 %v1800_v53, %v1793_v60  ;;  %v1805_v16 = vadd.f32 %v1800_v53, %v1795_v58  ;;  %v3076_v17 = vmax.f32 %v1804_v61, 0.0  ;;  %v3080_v63 = vmax.f32 %v1802_v59, 0.0 }
 0x191   :  { %v3078_v62 = vmax.f32 %v1805_v16, 0.0  ;;  %v3082_v18 = vmax.f32 %v1803_v15, 0.0 }
 0x193   :  { %v1853_v5 = vadd.f32 %v3078_v62, %v3076_v17  ;;  %v1812_v6 = vadd.f32 %v3082_v18, %v3080_v63  ;;  %v1870_v7 = vmax.f32 %v3076_v17, %v3078_v62  ;;  %v1830_v14 = vmax.f32 %v3080_v63, %v3082_v18 }
 0x195   :  { %1854 = vadd.xlane.f32.xlu0 %v1853_v5  ;;  %1813 = vadd.xlane.f32.xlu1 %v1812_v6 }
 0x199   :  { %1871 = vmax.xlane.f32.xlu0 %v1870_v7  ;;  %1831 = vmax.xlane.f32.xlu1 %v1830_v14 }
 0x21e   :  { %v1855_v20 = vpop.xlane.xlu0 %1854  ;;  %v1814_v21 = vpop.xlane.xlu1 %1813 }
 0x21f   :  { %v1856_v22 = vmul.f32 0.00390625, %v1855_v20  ;;  %v1816_v23 = vmul.f32 0.00390625, %v1814_v21 }
 0x221   :  { %v1857_v24 = vmul.f32 %v1856_v22, %v1810_v19  ;;  %v1817_v25 = vmul.f32 %v1816_v23, %v1810_v19 }
 0x222   :  { %v1872_v26 = vpop.xlane.xlu0 %1871  ;;  %v1832_v27 = vpop.xlane.xlu1 %1831 }
 0x223   :  { %v1858_v28 = vsel %vm122_vm3, %v1857_v24, 0.0  ;;  %v1818_v29 = vsel %vm122_vm3, %v1817_v25, 0.0  ;;  %v1873_v30 = vmul.f32 %v1872_v26, %v1810_v19  ;;  %v1833_v31 = vmul.f32 %v1832_v27, %v1810_v19 }
 0x224   :  { %v1859_v32 = vrot.slane %v1858_v28, 4  ;;  %v1819_v33 = vrot.slane %v1818_v29, 4 }
 0x225   :  { %v1874_v34 = vsel %vm122_vm3, %v1873_v30, 0.0  ;;  %v1834_v36 = vsel %vm122_vm3, %v1833_v31, 0.0 }
 0x226   :  { %v1860_v37 = vadd.f32 %v1859_v32, %v1858_v28  ;;  %v1820_v38 = vadd.f32 %v1819_v33, %v1818_v29  ;;  %v1875_v39 = vrot.slane %v1874_v34, 4  ;;  %v1835_v40 = vrot.slane %v1834_v36, 4 }
 0x228   :  { %v1861_v41 = vrot.slane %v1860_v37, 2  ;;  %v1821_v3 = vrot.slane %v1820_v38, 2  ;;  %v1876_v42 = vadd.f32 %v1875_v39, %v1874_v34  ;;  %v1836_v43 = vadd.f32 %v1835_v40, %v1834_v36 }
 0x22a   :  { %v1877_v44 = vrot.slane %v1876_v42, 2  ;;  %v1837_v45 = vrot.slane %v1836_v43, 2  ;;  %v1822_v1 = vadd.f32 %v1821_v3, %v1820_v38  ;;  %v1862_v46 = vadd.f32 %v1861_v41, %v1860_v37 }
 0x22c   :  { %v1878_v47 = vadd.f32 %v1877_v44, %v1876_v42  ;;  %v1838_v2 = vadd.f32 %v1837_v45, %v1836_v43  ;;  %v1823_v48 = vrot.slane %v1822_v1, 1  ;;  %v1863_v49 = vrot.slane %v1862_v46, 1 }
 0x22e   :  { %v1824_v0 = vadd.f32 %v1823_v48, %v1822_v1  ;;  %v1839_v50 = vrot.slane %v1838_v2, 1  ;;  %v1864_v51 = vadd.f32 %v1863_v49, %v1862_v46  ;;  %v1879_v4 = vrot.slane %v1878_v47, 1 }
 0x22f   :  { %v2199_v1 = vstv %s2639_s30  ;;  %v3128_v46 = vstv %s2640_s1  ;;  %s2647_s30 = sld [smem:[#allocation2 + $0x12]] }
 0x230   :  { %v1825_v53 = vmax.f32 %v1824_v0, 0.0  ;;  %v1840_v54 = vadd.f32 %v1839_v50, %v1838_v2  ;;  %v1865_v55 = vmax.f32 %v1864_v51, 0.0  ;;  %v1880_v56 = vadd.f32 %v1879_v4, %v1878_v47 }
 0x232   :  { %v1826_v57 = vmul.f32 %v1825_v53, %v1811_v52  ;;  %v1841_v60 = vmax.f32 %v1840_v54, 0.0  ;;  %v1881_v58 = vmax.f32 %v1880_v56, 0.0  ;;  %v1866_v15 = vmul.f32 %v1865_v55, %v1811_v52 }
 0x234   :  { %v1827_v59 = vsel %vm122_vm3, %v1826_v57, 0.0  ;;  %v1842_v61 = vmul.f32 %v1841_v60, %v1811_v52  ;;  %v1882_v5 = vmul.f32 %v1881_v58, %v1811_v52  ;;  %v1867_v6 = vsel %vm122_vm3, %v1866_v15, 0.0 }
 0x235   :  { %1828 = vadd.xlane.f32.xlu1 %v1827_v59 }
 0x236   :  { %v1843_v16 = vsel %vm122_vm3, %v1842_v61, 0.0  ;;  %v1883_v7 = vsel %vm122_vm3, %v1882_v5, 0.0 }
 0x237   :  { %1844 = vadd.xlane.f32.xlu0 %v1843_v16 }
 0x239   :  { %1868 = vadd.xlane.f32.xlu1 %v1867_v6 }
 0x23b   :  { %1884 = vadd.xlane.f32.xlu0 %v1883_v7 }
 0x2be   :  { %v1829_v14 = vpop.xlane.xlu1 %1828 }
 0x2c0   :  { %v1845_v19 = vpop.xlane.xlu0 %1844 }
 0x2c1   :  { %v1846_v20 = vadd.f32 %v1845_v19, %v1829_v14  ;;  %v2263_v19 = vstv %s3124_s5 }
 0x2c2   :  { %v1869_v22 = vpop.xlane.xlu1 %1868 }
 0x2c3   :  { %v2628_v21 = vmul.f32 -1.442695, %v1846_v20 }
 0x2c4   :  { %v1885_v23 = vpop.xlane.xlu0 %1884 }
 0x2c5   :  { %2665 = vpow2.f32 %v2628_v21  ;;  %v1886_v24 = vadd.f32 %v1885_v23, %v1869_v22  ;;  %v2257_v23 = vstv %s3130_s6 }
 0x2c7   :  { %v2629_v25 = vmul.f32 -1.442695, %v1886_v24 }
 0x2c9   :  { %2667 = vpow2.f32 %v2629_v25 }
 0x2d2   :  { %v2666_v26 = vpop.eup %2665 }
 0x2d3   :  { %v1850_v27 = vadd.f32 1.0, %v2666_v26 }
 0x2d5   :  { %2669 = vrcp.f32 %v1850_v27 }
 0x2d6   :  { %v2668_v28 = vpop.eup %2667 }
 0x2d7   :  { %v1890_v29 = vadd.f32 1.0, %v2668_v28 }
 0x2d9   :  { %2671 = vrcp.f32 %v1890_v29 }
 0x2e2   :  { %v2670_v30 = vpop.eup %2669 }
 0x2e3   :  { %v3107_v31 = vmul.f32 %v2670_v30, %v3080_v63  ;;  %v3110_v32 = vmul.f32 %v2670_v30, %v3082_v18 }
 0x2e5   :  { %v1897_v33 = vrot.slane %v3107_v31, 4  ;;  %v1903_v34 = vrot.slane %v3110_v32, 4 }
 0x2e6   :  { %v2672_v36 = vpop.eup %2671 }
 0x2e7   :  { %v1898_v37 = vadd.f32 %v1897_v33, %v3107_v31  ;;  %v1904_v38 = vadd.f32 %v1903_v34, %v3110_v32  ;;  %v1927_v39 = vmax.f32 %v3107_v31, %v1897_v33  ;;  %v1933_v40 = vmax.f32 %v3110_v32, %v1903_v34 }
 0x2e8   :  { %v3119_v41 = vmul.f32 %v2672_v36, %v3076_v17  ;;  %v3122_v63 = vmul.f32 %v2672_v36, %v3078_v62 }
 0x2e9   :  { %v1899_v18 = vrot.slane %v1898_v37, 2  ;;  %v1905_v3 = vrot.slane %v1904_v38, 2  ;;  %v1928_v42 = vrot.slane %v1927_v39, 2  ;;  %v1934_v43 = vrot.slane %v1933_v40, 2 }
 0x2ea   :  { %v1909_v44 = vrot.slane %v3119_v41, 4  ;;  %v1915_v45 = vrot.slane %v3122_v63, 4 }
 0x2eb   :  { %v1900_v17 = vadd.f32 %v1899_v18, %v1898_v37  ;;  %v1906_v47 = vadd.f32 %v1905_v3, %v1904_v38  ;;  %v1929_v2 = vmax.f32 %v1927_v39, %v1928_v42  ;;  %v1935_v62 = vmax.f32 %v1933_v40, %v1934_v43 }
 0x2ec   :  { %v1910_v48 = vadd.f32 %v1909_v44, %v3119_v41  ;;  %v1916_v49 = vadd.f32 %v1915_v45, %v3122_v63  ;;  %v1939_v0 = vmax.f32 %v3119_v41, %v1909_v44  ;;  %v1945_v50 = vmax.f32 %v3122_v63, %v1915_v45 }
 0x2ed   :  { %v1901_v51 = vrot.slane %v1900_v17, 1  ;;  %v1907_v4 = vrot.slane %v1906_v47, 1  ;;  %v1930_v52 = vrot.slane %v1929_v2, 1  ;;  %v1936_v53 = vrot.slane %v1935_v62, 1 }
 0x2ee   :  { %v1911_v54 = vrot.slane %v1910_v48, 2  ;;  %v1917_v55 = vrot.slane %v1916_v49, 2  ;;  %v1940_v56 = vrot.slane %v1939_v0, 2  ;;  %v1946_v57 = vrot.slane %v1945_v50, 2 }
 0x2ef   :  { %v1902_v60 = vadd.f32 %v1901_v51, %v1900_v17  ;;  %v1908_v58 = vadd.f32 %v1907_v4, %v1906_v47  ;;  %v3136_v59 = vmax.f32 %v1929_v2, %v1930_v52  ;;  %v3138_v61 = vmax.f32 %v1935_v62, %v1936_v53 }
 0x2f0   :  { %v1912_v15 = vadd.f32 %v1911_v54, %v1910_v48  ;;  %v1918_v16 = vadd.f32 %v1917_v55, %v1916_v49  ;;  %v1941_v5 = vmax.f32 %v1939_v0, %v1940_v56  ;;  %v1947_v6 = vmax.f32 %v1945_v50, %v1946_v57 }
 0x2f1   :  { %v3140_v7 = vmul.f32 0.125, %v1902_v60  ;;  %v3142_v14 = vmul.f32 0.125, %v1908_v58  ;;  %v2207_v25 = vmul.f32 %v3128_v46, %v3138_v61  ;;  %v2206_v27 = vmul.f32 %v3128_v46, %v3136_v59 }
 0x2f2   :  { %v1913_v20 = vrot.slane %v1912_v15, 1  ;;  %v1919_v21 = vrot.slane %v1918_v16, 1  ;;  %v1942_v22 = vrot.slane %v1941_v5, 1  ;;  %v1948_v33 = vrot.slane %v1947_v6, 1 }
 0x2f3   :  { %v2201_v24 = vmul.f32 %v2199_v1, %v3142_v14  ;;  %v2200_v26 = vmul.f32 %v2199_v1, %v3140_v7  ;;  %v2258_v37 = vmul.f32 %v2257_v23, %v3140_v7  ;;  %v2264_v40 = vmul.f32 %v2263_v19, %v3136_v59 }
 0x2f4   :  { %v1914_v28 = vadd.f32 %v1913_v20, %v1912_v15  ;;  %v1920_v29 = vadd.f32 %v1919_v21, %v1918_v16  ;;  %v3152_v30 = vmax.f32 %v1941_v5, %v1942_v22  ;;  %v3162_v18 = vmax.f32 %v1947_v6, %v1948_v33 }
 0x2f5   :  { %v2211_v34 = vadd.f32 %v2207_v25, %v2201_v24  ;;  %v2210_v36 = vadd.f32 %v2206_v27, %v2200_v26  ;;  %v2268_v43 = vadd.f32 %v2264_v40, %v2258_v37  ;;  %v2315_v47 = vstv %s2643_s7 }
 0x2f6   :  { %v3155_v38 = vmul.f32 0.125, %v1914_v28  ;;  %v3157_v39 = vmul.f32 0.125, %v1920_v29  ;;  %v2208_v42 = vmul.f32 %v3128_v46, %v3152_v30  ;;  %v2266_v2 = vmul.f32 %v2263_v19, %v3152_v30 }
 0x2f7   :  { %2216 = vrot.lane.b32.xlu0 %v2211_v34, %s2702_s24  ;;  %2214 = vrot.lane.b32.xlu1 %v2210_v36, %s2702_s24  ;;  %v2209_v62 = vmul.f32 %v3128_v46, %v3162_v18  ;;  %v2321_v48 = vstv %s2644_s8  ;;  %v2316_v0 = vmul.f32 %v2315_v47, %v3140_v7  ;;  %v2259_v51 = vmul.f32 %v2257_v23, %v3142_v14 }
 0x2f8   :  { %v2202_v3 = vmul.f32 %v2199_v1, %v3155_v38  ;;  %v2260_v44 = vmul.f32 %v2257_v23, %v3155_v38  ;;  %v2203_v17 = vmul.f32 %v2199_v1, %v3157_v39  ;;  %v2322_v1 = vmul.f32 %v2321_v48, %v3136_v59 }
 0x2f9   :  { %v2265_v4 = vmul.f32 %v2263_v19, %v3138_v61  ;;  %v2318_v46 = vmul.f32 %v2315_v47, %v3155_v38  ;;  %v2261_v54 = vmul.f32 %v2257_v23, %v3157_v39  ;;  %v1951_v55 = vstv %s1950_s9 }
 0x2fa   :  { %v2212_v45 = vadd.f32 %v2208_v42, %v2202_v3  ;;  %v2270_v49 = vadd.f32 %v2266_v2, %v2260_v44  ;;  %v2213_v50 = vadd.f32 %v2209_v62, %v2203_v17  ;;  %v2326_v52 = vadd.f32 %v2322_v1, %v2316_v0 }
 0x2fb   :  { %2272 = vrot.lane.b32.xlu0 %v2268_v43, %s2708_s29  ;;  %v2269_v53 = vadd.f32 %v2265_v4, %v2259_v51  ;;  %v2324_v56 = vmul.f32 %v2321_v48, %v3152_v30  ;;  %v2267_v57 = vmul.f32 %v2263_v19, %v3162_v18  ;;  %v1957_v60 = vstv %s2630_s10 }
 0x2fc   :  { %2218 = vrot.lane.b32.xlu1 %v2212_v45, %s2702_s24  ;;  %v1952_v15 = vmul.f32 %v1951_v55, %v3140_v7  ;;  %v2317_v5 = vmul.f32 %v2315_v47, %v3142_v14  ;;  %v1958_v6 = vmul.f32 %v1957_v60, %v3136_v59  ;;  %v2323_v20 = vmul.f32 %v2321_v48, %v3138_v61 }
 0x2fd   :  { %v2328_v58 = vadd.f32 %v2324_v56, %v2318_v46  ;;  %v2271_v16 = vadd.f32 %v2267_v57, %v2261_v54  ;;  %v1954_v21 = vmul.f32 %v1951_v55, %v3155_v38  ;;  %v2183_v22 = vstv %s2637_s11 }
 0x2fe   :  { %v1962_v23 = vadd.f32 %v1958_v6, %v1952_v15  ;;  %v2009_v19 = vstv %s2631_s12  ;;  %v2327_v24 = vadd.f32 %v2323_v20, %v2317_v5  ;;  %v2319_v25 = vmul.f32 %v2315_v47, %v3157_v39 }
 0x2ff   :  { %2276 = vrot.lane.b32.xlu0 %v2270_v49, %s2708_s29  ;;  %v1960_v26 = vmul.f32 %v1957_v60, %v3152_v30  ;;  %v2189_v27 = vstv %s2638_s13  ;;  %v2325_v28 = vmul.f32 %v2321_v48, %v3162_v18  ;;  %v2015_v29 = vstv %s2632_s14 }
 0x300   :  { %2220 = vrot.lane.b32.xlu1 %v2213_v50, %s2702_s24  ;;  %s3195_s24 = sld [smem:[#allocation2 + $0x4]]  ;;  %v2184_v33 = vmul.f32 %v2183_v22, %v3140_v7  ;;  %v2185_v36 = vmul.f32 %v2183_v22, %v3142_v14  ;;  %v2186_v37 = vmul.f32 %v2183_v22, %v3155_v38  ;;  %v2187_v40 = vmul.f32 %v2183_v22, %v3157_v39 }
 0x301   :  { %v1964_v34 = vadd.f32 %v1960_v26, %v1954_v21  ;;  %v2010_v3 = vmul.f32 %v2009_v19, %v3140_v7  ;;  %v2190_v42 = vmul.f32 %v2189_v27, %v3136_v59  ;;  %v2191_v43 = vmul.f32 %v2189_v27, %v3138_v61 }
 0x302   :  { %v2192_v44 = vmul.f32 %v2189_v27, %v3152_v30  ;;  %v2329_v45 = vadd.f32 %v2325_v28, %v2319_v25  ;;  %v1953_v17 = vmul.f32 %v1951_v55, %v3142_v14  ;;  %v2193_v47 = vmul.f32 %v2189_v27, %v3162_v18 }
 0x303   :  { %2330 = vrot.lane.b32.xlu0 %v2326_v52, %s2703_s25  ;;  %v2016_v2 = vmul.f32 %v2015_v29, %v3136_v59  ;;  %v3212_v62 = vadd.f32 %v2190_v42, %v2184_v33  ;;  %v3214_v48 = vadd.f32 %v2191_v43, %v2185_v36  ;;  %v1959_v0 = vmul.f32 %v1957_v60, %v3138_v61 }
 0x304   :  { %2274 = vrot.lane.b32.xlu1 %v2269_v53, %s2708_s29  ;;  %v3216_v49 = vadd.f32 %v2192_v44, %v2186_v37  ;;  %v3220_v50 = vadd.f32 %v2193_v47, %v2187_v40  ;;  %v2012_v1 = vmul.f32 %v2009_v19, %v3155_v38  ;;  %v1955_v52 = vmul.f32 %v1951_v55, %v3157_v39 }
 0x305   :  { %v2020_v51 = vadd.f32 %v2016_v2, %v2010_v3  ;;  %v1963_v4 = vadd.f32 %v1959_v0, %v1953_v17  ;;  %v2018_v53 = vmul.f32 %v2015_v29, %v3152_v30  ;;  %v1961_v54 = vmul.f32 %v1957_v60, %v3162_v18 }
 0x306   :  { %v2067_v46 = vstv %s3195_s24  ;;  %v2017_v5 = vmul.f32 %v2015_v29, %v3138_v61  ;;  %v2013_v21 = vmul.f32 %v2009_v19, %v3157_v39  ;;  %v2125_v22 = vstv %s2635_s15 }
 0x307   :  { %2334 = vrot.lane.b32.xlu0 %v2328_v58, %s2703_s25  ;;  %v2022_v57 = vadd.f32 %v2018_v53, %v2012_v1  ;;  %v2068_v58 = vmul.f32 %v2067_v46, %v3140_v7  ;;  %v1965_v15 = vadd.f32 %v1961_v54, %v1955_v52  ;;  %v2070_v20 = vmul.f32 %v2067_v46, %v3155_v38 }
 0x308   :  { %2278 = vrot.lane.b32.xlu1 %v2271_v16, %s2708_s29  ;;  %s2634_s29 = sld [smem:[#allocation2 + $0x5]]  ;;  %v2011_v16 = vmul.f32 %v2009_v19, %v3142_v14  ;;  %v2126_v27 = vmul.f32 %v2125_v22, %v3140_v7  ;;  %v2069_v33 = vmul.f32 %v2067_v46, %v3142_v14  ;;  %v2128_v37 = vmul.f32 %v2125_v22, %v3155_v38 }
 0x309   :  { %v2071_v40 = vmul.f32 %v2067_v46, %v3157_v39  ;;  %v2373_v3 = vstv %s2645_s16  ;;  %v2127_v2 = vmul.f32 %v2125_v22, %v3142_v14  ;;  %v2129_v46 = vmul.f32 %v2125_v22, %v3157_v39 }
 0x30a   :  { %v2021_v60 = vadd.f32 %v2017_v5, %v2011_v16  ;;  %v2374_v17 = vmul.f32 %v2373_v3, %v3140_v7  ;;  %v2709_v5 = vmov 1966171168  }
 0x30b   :  { %1966 = vrot.lane.b32.xlu0 %v1962_v23, %s2705_s27 }
 0x30c   :  { %2332 = vrot.lane.b32.xlu1 %v2327_v24, %s2703_s25  ;;  %v2019_v24 = vmul.f32 %v2015_v29, %v3162_v18 }
 0x30e   :  { %v2073_v56 = vstv %s2634_s29  ;;  %v2023_v28 = vadd.f32 %v2019_v24, %v2013_v21 }
 0x30f   :  { %1970 = vrot.lane.b32.xlu0 %v1964_v34, %s2705_s27  ;;  %v2074_v55 = vmul.f32 %v2073_v56, %v3136_v59  ;;  %v2076_v23 = vmul.f32 %v2073_v56, %v3152_v30  ;;  %v2075_v34 = vmul.f32 %v2073_v56, %v3138_v61  ;;  %v2077_v43 = vmul.f32 %v2073_v56, %v3162_v18 }
 0x310   :  { %2336 = vrot.lane.b32.xlu1 %v2329_v45, %s2703_s25  ;;  %s2636_s25 = sld [smem:[#allocation2 + $0x7]]  ;;  %v2375_v56 = vmul.f32 %v2373_v3, %v3142_v14  ;;  %v1985_v14 = vunpack.c.l.s4 %v2709_v5 }
 0x311   :  { %v2078_v6 = vadd.f32 %v2074_v55, %v2068_v58  ;;  %v2080_v26 = vadd.f32 %v2076_v23, %v2070_v20  ;;  %v2079_v29 = vadd.f32 %v2075_v34, %v2069_v33  ;;  %v2081_v47 = vadd.f32 %v2077_v43, %v2071_v40  ;;  %v2677_v43 = vld [vmem:[%s3417_s2 + $0x5] ss:$8 sm:$0xf] }
 0x312   :  { %v2377_v58 = vmul.f32 %v2373_v3, %v3157_v39  ;;  %v1986_v20 = vunpack.c.0.s8 %v1985_v14 }
 0x313   :  { %2024 = vrot.lane.b32.xlu0 %v2020_v51, %s2699_s23 }
 0x314   :  { %1968 = vrot.lane.b32.xlu1 %v1963_v4, %s2705_s27  ;;  %v2376_v4 = vmul.f32 %v2373_v3, %v3155_v38  ;;  %v3278_v22 = vsub.s32 %v1986_v20, %v2825_v8 }
 0x316   :  { %v2131_v25 = vstv %s2636_s25 }
 0x317   :  { %2028 = vrot.lane.b32.xlu0 %v2022_v57, %s2699_s23  ;;  %v2132_v19 = vmul.f32 %v2131_v25, %v3136_v59  ;;  %v2134_v42 = vmul.f32 %v2131_v25, %v3152_v30  ;;  %v2133_v51 = vmul.f32 %v2131_v25, %v3138_v61  ;;  %v2135_v53 = vmul.f32 %v2131_v25, %v3162_v18 }
 0x318   :  { %1972 = vrot.lane.b32.xlu1 %v1965_v15, %s2705_s27  ;;  %s2646_s27 = sld [smem:[#allocation2 + $0x11]] }
 0x319   :  { %v2136_v36 = vadd.f32 %v2132_v19, %v2126_v27  ;;  %v2138_v45 = vadd.f32 %v2134_v42, %v2128_v37  ;;  %v2137_v52 = vadd.f32 %v2133_v51, %v2127_v2 }
 0x31b   :  { %2082 = vrot.lane.b32.xlu0 %v2078_v6, %s2706_s28 }
 0x31c   :  { %2026 = vrot.lane.b32.xlu1 %v2021_v60, %s2699_s23 }
 0x31e   :  { %v2379_v44 = vstv %s2646_s27 }
 0x31f   :  { %2086 = vrot.lane.b32.xlu0 %v2080_v26, %s2706_s28  ;;  %v2380_v0 = vmul.f32 %v2379_v44, %v3136_v59  ;;  %v2382_v7 = vmul.f32 %v2379_v44, %v3152_v30  ;;  %v2139_v59 = vadd.f32 %v2135_v53, %v2129_v46  ;;  %v2381_v38 = vmul.f32 %v2379_v44, %v3138_v61 }
 0x320   :  { %2030 = vrot.lane.b32.xlu1 %v2023_v28, %s2699_s23  ;;  %v2383_v30 = vmul.f32 %v2379_v44, %v3162_v18 }
 0x321   :  { %v2384_v1 = vadd.f32 %v2380_v0, %v2374_v17  ;;  %v2386_v54 = vadd.f32 %v2382_v7, %v2376_v4  ;;  %v2385_v57 = vadd.f32 %v2381_v38, %v2375_v56 }
 0x322   :  { %v2387_v15 = vadd.f32 %v2383_v30, %v2377_v58 }
 0x323   :  { %2140 = vrot.lane.b32.xlu0 %v2136_v36, %s2701_s0 }
 0x324   :  { %2084 = vrot.lane.b32.xlu1 %v2079_v29, %s2706_s28 }
 0x327   :  { %2144 = vrot.lane.b32.xlu0 %v2138_v45, %s2701_s0 }
 0x328   :  { %2088 = vrot.lane.b32.xlu1 %v2081_v47, %s2706_s28 }
 0x32b   :  { %2388 = vrot.lane.b32.xlu0 %v2384_v1, %s2704_s26 }
 0x32c   :  { %2142 = vrot.lane.b32.xlu1 %v2137_v52, %s2701_s0 }
 0x32f   :  { %2392 = vrot.lane.b32.xlu0 %v2386_v54, %s2704_s26 }
 0x330   :  { %2146 = vrot.lane.b32.xlu1 %v2139_v59, %s2701_s0 }
 0x334   :  { %2390 = vrot.lane.b32.xlu1 %v2385_v57, %s2704_s26 }
 0x338   :  { %2394 = vrot.lane.b32.xlu1 %v2387_v15, %s2704_s26 }
 0x369   :  { %v2217_v16 = vpop.permute.xlu0 %2216  ;;  %v2215_v55 = vpop.permute.xlu1 %2214 }
 0x36a   :  { %v2224_v39 = vsel %vm531_vm4, %v2215_v55, %v2217_v16 }
 0x36d   :  { %v2273_v6 = vpop.permute.xlu0 %2272 }
 0x36e   :  { %v2219_v60 = vpop.permute.xlu1 %2218 }
 0x36f   :  { %v2223_v61 = vsel %vm531_vm4, %v2217_v16, %v2219_v60 }
 0x370   :  { %v2230_v18 = vcombine.low %v2224_v39, %v2223_v61 }
 0x371   :  { %v2277_v21 = vpop.permute.xlu0 %2276 }
 0x372   :  { %v2221_v23 = vpop.permute.xlu1 %2220  ;;  %v2238_v28 = vrot.slane %v2230_v18, %v3278_v22 }
 0x373   :  { %v2222_v24 = vsel %vm531_vm4, %v2219_v60, %v2221_v23  ;;  %v2225_v25 = vsel %vm531_vm4, %v2221_v23, %v2215_v55 }
 0x374   :  { %v2231_v26 = vcombine.low %v2222_v24, %v2225_v25 }
 0x375   :  { %v2331_v27 = vpop.permute.xlu0 %2330 }
 0x376   :  { %v2245_v33 = vrot.slane %v2231_v26, %v3278_v22  ;;  %v2275_v19 = vpop.permute.xlu1 %2274 }
 0x377   :  { %v2281_v37 = vsel %vm729_vm9, %v2275_v19, %v2277_v21  ;;  %v2282_v29 = vsel %vm729_vm9, %v2273_v6, %v2275_v19 }
 0x378   :  { %v2246_v34 = vcombine.low %v2238_v28, %v2245_v33  ;;  %v2288_v17 = vcombine.low %v2282_v29, %v2281_v37 }
 0x379   :  { %v2335_v36 = vpop.permute.xlu0 %2334 }
 0x37a   :  { %v2253_v8 = vrot.slane %v2246_v34, %v3278_v22  ;;  %v2279_v40 = vpop.permute.xlu1 %2278  ;;  %v2296_v57 = vrot.slane %v2288_v17, %v3278_v22 }
 0x37b   :  { %v2280_v3 = vsel %vm729_vm9, %v2277_v21, %v2279_v40  ;;  %v2283_v42 = vsel %vm729_vm9, %v2279_v40, %v2273_v6  ;;  %v2678_v21 = vld [vmem:[%s3417_s2 + $0x7] ss:$8 sm:$0xf] }
 0x37c   :  { %v2255_v44 = vmul.f32 %v2677_v43, %v2253_v8  ;;  %v2289_v45 = vcombine.low %v2280_v3, %v2283_v42 }
 0x37d   :  { %v1967_v47 = vpop.permute.xlu0 %1966 }
 0x37e   :  { %v2436_v2 = vrot.slane %v2255_v44, %v2830_v10  ;;  %v2440_v0 = vrot.slane %v2255_v44, %v2839_v13  ;;  %v2444_v51 = vrot.slane %v2255_v44, %v2833_v11  ;;  %v2448_v1 = vrot.slane %v2255_v44, %v2836_v12  ;;  %v2333_v4 = vpop.permute.xlu1 %2332 }
 0x37f   :  { %v2303_v52 = vrot.slane %v2289_v45, %v3278_v22  ;;  %v2339_v46 = vsel %vm770_vm5, %v2333_v4, %v2335_v36  ;;  %v2340_v7 = vsel %vm770_vm5, %v2331_v27, %v2333_v4 }
 0x380   :  { %v2453_v53 = vadd.f32 %v2436_v2, %v3212_v62  ;;  %v2454_v54 = vadd.f32 %v2440_v0, %v3214_v48  ;;  %v2455_v59 = vadd.f32 %v2444_v51, %v3216_v49  ;;  %v2456_v56 = vadd.f32 %v2448_v1, %v3220_v50 }
 0x381   :  { %v1971_v38 = vpop.permute.xlu0 %1970  ;;  %v2346_v58 = vcombine.low %v2340_v7, %v2339_v46  ;;  %v2304_v55 = vcombine.low %v2296_v57, %v2303_v52 }
 0x382   :  { %v2337_v30 = vpop.permute.xlu1 %2336 }
 0x383   :  { %v2338_v15 = vsel %vm770_vm5, %v2335_v36, %v2337_v30  ;;  %v2341_v16 = vsel %vm770_vm5, %v2337_v30, %v2331_v27  ;;  %v2354_v48 = vrot.slane %v2346_v58, %v3278_v22  ;;  %v2311_v50 = vrot.slane %v2304_v55, %v3278_v22 }
 0x384   :  { %v2347_v5 = vcombine.low %v2338_v15, %v2341_v16 }
 0x385   :  { %v2025_v62 = vpop.permute.xlu0 %2024  ;;  %v2313_v39 = vmul.f32 %v3028_v35, %v2311_v50 }
 0x386   :  { %v2361_v49 = vrot.slane %v2347_v5, %v3278_v22  ;;  %v1969_v14 = vpop.permute.xlu1 %1968 }
 0x387   :  { %v1975_v2 = vsel %vm50_vm7, %v1969_v14, %v1971_v38  ;;  %v1976_v46 = vsel %vm50_vm7, %v1967_v47, %v1969_v14 }
 0x388   :  { %v2362_v6 = vcombine.low %v2354_v48, %v2361_v49 }
 0x389   :  { %v2029_v20 = vpop.permute.xlu0 %2028 }
 0x38a   :  { %v2369_v60 = vrot.slane %v2362_v6, %v3278_v22  ;;  %v1973_v61 = vpop.permute.xlu1 %1972 }
 0x38b   :  { %v1974_v51 = vsel %vm50_vm7, %v1971_v38, %v1973_v61  ;;  %v1977_v1 = vsel %vm50_vm7, %v1973_v61, %v1967_v47 }
 0x38c   :  { %v2371_v18 = vmul.f32 %v2678_v21, %v2369_v60  ;;  %v1982_v15 = vcombine.low %v1977_v1, %v1976_v46  ;;  %v1983_v47 = vcombine.low %v1975_v2, %v1974_v51  ;;  %v2681_v1 = vld [vmem:[%s3417_s2 + $0x2] ss:$8 sm:$0xf] }
 0x38d   :  { %v2083_v23 = vpop.permute.xlu0 %2082 }
 0x38e   :  { %v2457_v24 = vadd.f32 %v2371_v18, %v2313_v39  ;;  %v2027_v25 = vpop.permute.xlu1 %2026  ;;  %v1990_v49 = vrot.slane %v1982_v15, %v3278_v22  ;;  %v1997_v14 = vrot.slane %v1983_v47, %v3278_v22  ;;  %v2683_v15 = vld [vmem:[%s3417_s2 + $0x20] ss:$8 sm:$0xf] }
 0x38f   :  { %v2033_v4 = vsel %vm91_vm0, %v2027_v25, %v2029_v20  ;;  %v2034_v52 = vsel %vm91_vm0, %v2025_v62, %v2027_v25 }
 0x390   :  { %v2463_v26 = vrot.slane %v2457_v24, %v2830_v10  ;;  %v2467_v27 = vrot.slane %v2457_v24, %v2839_v13  ;;  %v2471_v28 = vrot.slane %v2457_v24, %v2833_v11  ;;  %v2475_v33 = vrot.slane %v2457_v24, %v2836_v12 }
 0x391   :  { %v2087_v19 = vpop.permute.xlu0 %2086  ;;  %v1998_v24 = vcombine.low %v1990_v49, %v1997_v14 }
 0x392   :  { %v2480_v34 = vadd.f32 %v2463_v26, %v2453_v53  ;;  %v2481_v36 = vadd.f32 %v2467_v27, %v2454_v54  ;;  %v2482_v35 = vadd.f32 %v2471_v28, %v2455_v59  ;;  %v2483_v8 = vadd.f32 %v2475_v33, %v2456_v56  ;;  %v2031_v37 = vpop.permute.xlu1 %2030 }
 0x393   :  { %v2032_v45 = vsel %vm91_vm0, %v2029_v20, %v2031_v37  ;;  %v2035_v17 = vsel %vm91_vm0, %v2031_v37, %v2025_v62  ;;  %v2005_v37 = vrot.slane %v1998_v24, %v3278_v22 }
 0x394   :  { %v2488_v29 = vcombine.low %v2480_v34, %v2481_v36  ;;  %v2489_v40 = vcombine.low %v2482_v35, %v2483_v8  ;;  %v2040_v7 = vcombine.low %v2035_v17, %v2034_v52  ;;  %v2041_v53 = vcombine.low %v2033_v4, %v2032_v45  ;;  %v2682_v52 = vld [vmem:[%s3417_s2 + $0x3] ss:$8 sm:$0xf] }
 0x395   :  { %v2141_v3 = vpop.permute.xlu0 %2140 }
 0x396   :  { %v2085_v42 = vpop.permute.xlu1 %2084  ;;  %v2496_v43 = vrot.slane %v2488_v29, %v3278_v22  ;;  %v2503_v44 = vrot.slane %v2489_v40, %v3278_v22  ;;  %v2048_v5 = vrot.slane %v2040_v7, %v3278_v22  ;;  %v2055_v62 = vrot.slane %v2041_v53, %v3278_v22 }
 0x397   :  { %v2091_v38 = vsel %vm291_vm8, %v2085_v42, %v2087_v19  ;;  %v2092_v57 = vsel %vm291_vm8, %v2083_v23, %v2085_v42 }
 0x398   :  { %v2504_v0 = vcombine.low %v2496_v43, %v2503_v44  ;;  %v2056_v60 = vcombine.low %v2048_v5, %v2055_v62 }
 0x399   :  { %v2145_v54 = vpop.permute.xlu0 %2144 }
 0x39a   :  { %v2089_v59 = vpop.permute.xlu1 %2088  ;;  %v2511_v56 = vrot.slane %v2504_v0, %v3278_v22  ;;  %v2063_v28 = vrot.slane %v2056_v60, %v3278_v22  ;;  %v2680_v0 = vld [vmem:[%s3417_s2] ss:$8 sm:$0xf] }
 0x39b   :  { %v2090_v58 = vsel %vm291_vm8, %v2087_v19, %v2089_v59  ;;  %v2093_v30 = vsel %vm291_vm8, %v2089_v59, %v2083_v23  ;;  %v2007_v51 = vmul.f32 %v2680_v0, %v2005_v37 }
 0x39c   :  { %v2098_v16 = vcombine.low %v2093_v30, %v2092_v57  ;;  %v2099_v55 = vcombine.low %v2091_v38, %v2090_v58 }
 0x39d   :  { %v2389_v20 = vpop.permute.xlu0 %2388 }
 0x39e   :  { %v2143_v48 = vpop.permute.xlu1 %2142  ;;  %v2106_v50 = vrot.slane %v2098_v16, %v3278_v22  ;;  %v2113_v6 = vrot.slane %v2099_v55, %v3278_v22  ;;  %v2516_v16 = vstv %s2647_s30 }
 0x39f   :  { %v2149_v39 = vsel %vm332_vm2, %v2143_v48, %v2145_v54  ;;  %v2150_v21 = vsel %vm332_vm2, %v2141_v3, %v2143_v48 }
 0x3a0   :  { %v2114_v25 = vcombine.low %v2106_v50, %v2113_v6 }
 0x3a1   :  { %v2393_v33 = vpop.permute.xlu0 %2392 }
 0x3a2   :  { %v2147_v61 = vpop.permute.xlu1 %2146  ;;  %v2121_v29 = vrot.slane %v2114_v25, %v3278_v22 }
 0x3a3   :  { %v2148_v18 = vsel %vm332_vm2, %v2145_v54, %v2147_v61  ;;  %v2151_v23 = vsel %vm332_vm2, %v2147_v61, %v2141_v3  ;;  %v2679_v3 = vld [vmem:[%s3417_s2 + $0x1] ss:$8 sm:$0xf] }
 0x3a4   :  { %v2156_v26 = vcombine.low %v2151_v23, %v2150_v21  ;;  %v2157_v27 = vcombine.low %v2149_v39, %v2148_v18  ;;  %v2065_v42 = vmul.f32 %v2679_v3, %v2063_v28  ;;  %v2123_v4 = vmul.f32 %v2681_v1, %v2121_v29 }
 0x3a6   :  { %v2164_v19 = vrot.slane %v2156_v26, %v3278_v22  ;;  %v2171_v34 = vrot.slane %v2157_v27, %v3278_v22  ;;  %v2391_v36 = vpop.permute.xlu1 %2390  ;;  %v2430_v53 = vadd.f32 %v2065_v42, %v2007_v51 }
 0x3a7   :  { %v2397_v35 = vsel %vm968_vm6, %v2391_v36, %v2393_v33  ;;  %v2398_v8 = vsel %vm968_vm6, %v2389_v20, %v2391_v36 }
 0x3a8   :  { %v2172_v40 = vcombine.low %v2164_v19, %v2171_v34  ;;  %v2404_v44 = vcombine.low %v2398_v8, %v2397_v35 }
 0x3aa   :  { %v2179_v43 = vrot.slane %v2172_v40, %v3278_v22  ;;  %v2395_v45 = vpop.permute.xlu1 %2394  ;;  %v2412_v54 = vrot.slane %v2404_v44, %v3278_v22 }
 0x3ab   :  { %v2396_v17 = vsel %vm968_vm6, %v2393_v33, %v2395_v45  ;;  %v2399_v2 = vsel %vm968_vm6, %v2395_v45, %v2389_v20 }
 0x3ac   :  { %v2181_v46 = vmul.f32 %v2682_v52, %v2179_v43  ;;  %v2405_v7 = vcombine.low %v2396_v17, %v2399_v2 }
 0x3ae   :  { %v2431_v9 = vadd.f32 %v2181_v46, %v2123_v4  ;;  %v2419_v59 = vrot.slane %v2405_v7, %v3278_v22 }
 0x3b0   :  { %v2458_v38 = vadd.f32 %v2431_v9, %v2430_v53  ;;  %v2420_v57 = vcombine.low %v2412_v54, %v2419_v59 }
 0x3b2   :  { %v2513_v58 = vadd.f32 %v2511_v56, %v2458_v38  ;;  %v2427_v30 = vrot.slane %v2420_v57, %v3278_v22 }
 0x3b4   :  { %v2429_v47 = vmul.f32 %v2683_v15, %v2427_v30 }
 0x3b6   :  { %v2514_v55 = vadd.f32 %v2513_v58, %v2429_v47 }
 0x3b8   :  { %v2517_v5 = vadd.f32 %v2516_v16, %v2514_v55 }
 0x3ba   :  { %v2648_v62 = vmul.f32 -1.442695, %v2517_v5 }
 0x3bc   :  { %2673 = vpow2.f32 %v2648_v62 }
 0x3c9   :  { %v2674_v48 = vpop.eup %2673 }
 0x3ca   :  { %v2521_v49 = vadd.f32 1.0, %v2674_v48 }
 0x3cc   :  { %2675 = vrcp.f32 %v2521_v49 }
 0x3d9   :  { %v2676_v14 = vpop.eup %2675 }
 0x3da   :  { %v2536_v50 = vrot.slane %v2676_v14, %v2833_v11  ;;  %v2540_v56 = vrot.slane %v2676_v14, %v2836_v12  ;;  %v2528_v22 = vrot.slane %v2676_v14, %v2830_v10  ;;  %v2532_v6 = vrot.slane %v2676_v14, %v2839_v13 }
 0x3dc   :  { %v2547_v20 = vmul.f32 %v2536_v50, %v3119_v41  ;;  %v2548_v60 = vmul.f32 %v2540_v56, %v3122_v63  ;;  %v2545_v61 = vmul.f32 %v2528_v22, %v3107_v31  ;;  %v2546_v39 = vmul.f32 %v2532_v6, %v3110_v32 }
 0x3de   :  { %v2555_v21 = vadd.f32 %v2548_v60, %v2547_v20  ;;  %v2549_v18 = vadd.f32 %v2546_v39, %v2545_v61 }
 0x3e0   :  { %2556 = vadd.xlane.f32.xlu1 %v2555_v21  ;;  %2550 = vadd.xlane.f32.xlu0 %v2549_v18 }
 0x469   :  { %v2557_v11 = vpop.xlane.xlu1 %2556  ;;  %v2551_v23 = vpop.xlane.xlu0 %2550 }
 0x46a   :  { %v2558_v12 = vmul.f32 0.00390625, %v2557_v11  ;;  %v2552_v24 = vmul.f32 0.00390625, %v2551_v23 }
 0x46c   :  { %2649 = vst.msk [vmem:[%s3419_s4 + $0x8] sm:$0xff] %vm2553_vm10, %v2558_v12  ;;  %2554 = vst.msk [vmem:[%s3419_s4] sm:$0xff] %vm2553_vm10, %v2552_v24 }
 0x46d   :  { %2565 = vsyncpa [#allocation3], 1 }

</bundles_post_ra>
